<compile_context>
chip_gen: v7x
topology: tpu7x:2x2x1
jax: 0.10.0
libtpu: 0.0.40
codegen_flags: <defaults>
</compile_context>

<pallas_src>
import jax
import jax.numpy as jnp
import numpy as np
from jax.experimental import pallas as pl
from jax.experimental.pallas import tpu as pltpu

NUM_LAYERS = 2
HIDDEN = 32
INPUT = 16
BATCH = 2
BATCH_PAD = 8      # pad batch to one full sublane group
SEQ = 8
DT = 1.0           # carried by RNN_Serial; unused by the LSTM-cell RNN_model


def _apply_gates(gates, c_prev, H):
    """PyTorch LSTMCell gate math. Gate order: i, f, g, o.

    Activations are applied to the full (B, 4H) tile first (two independent
    EUP passes that overlap in the EUP FIFO), then the narrow lane slices are
    taken off the critical dependency chain.
    """
    sig = jax.nn.sigmoid(gates)
    th = jnp.tanh(gates)
    i = sig[:, 0 * H:1 * H]
    f = sig[:, 1 * H:2 * H]
    g = th[:, 2 * H:3 * H]
    o = sig[:, 3 * H:4 * H]
    c_new = f * c_prev + i * g
    h_new = o * jnp.tanh(c_new)
    return h_new, c_new


def lstm_seq_kernel(x2d_ref, wih0_ref, whh0_ref, b0_ref,
                    wih1_ref, whh1_ref, b1_ref, out_ref):
    BP = out_ref.shape[0]              # padded batch (8)
    H = out_ref.shape[1] // 4          # hidden size
    S = x2d_ref.shape[0] // BP         # sequence length

    # Hoisted layer-0 input projection (+ bias): one MXU matmul for all steps.
    xproj = (jnp.dot(x2d_ref[...], wih0_ref[...],
                     preferred_element_type=jnp.float32) + b0_ref[...])

    whh0 = whh0_ref[...]
    wih1 = wih1_ref[...]
    whh1 = whh1_ref[...]
    # Hoisted: broadcast_in_dim is not CSE'd, so do it once, not S times.
    b1 = jnp.broadcast_to(b1_ref[...], (BP, 4 * H))

    # h_c is None in RNN_Serial.forward -> zero-initialized carried state.
    h0 = jnp.zeros((BP, H), jnp.float32)
    c0 = jnp.zeros((BP, H), jnp.float32)
    h1 = jnp.zeros((BP, H), jnp.float32)
    c1 = jnp.zeros((BP, H), jnp.float32)

    # Fully unrolled serial recurrence; (h, c) stay in vregs.
    for t in range(S):
        # Layer 0: x @ W_ih + b hoisted; per step only h0 @ W_hh.
        # Slice is sublane-aligned: rows [t*8, (t+1)*8) = one full (8,128) vreg.
        g0 = xproj[t * BP:(t + 1) * BP, :] + jnp.dot(
            h0, whh0, preferred_element_type=jnp.float32)
        h0, c0 = _apply_gates(g0, c0, H)

        # Layer 1: two independent MXU matmuls (no per-step lane concat).
        g1 = (jnp.dot(h0, wih1, preferred_element_type=jnp.float32) +
              jnp.dot(h1, whh1, preferred_element_type=jnp.float32) + b1)
        h1, c1 = _apply_gates(g1, c1, H)

    # Lane-dense output: one (8, 128) slab = [h0 | h1 | c0 | c1].
    out_ref[...] = jnp.concatenate([h0, h1, c0, c1], axis=-1)


def rnn_serial_forward(x, params):
    """Returns (h, c), each (num_layers, batch, hidden), like RNN_Serial."""
    B, S, I = x.shape
    wih0, whh0, b0, wih1, whh1, b1 = params
    H = whh0.shape[0]
    BP = BATCH_PAD

    # Layout plumbing only (no compute moved out of the kernel):
    #  - time-major layout, batch padded to one sublane group (zeros), then
    #    flattened so rows [t*BP, (t+1)*BP) are time step t.
    x_tm = jnp.transpose(x, (1, 0, 2))                       # (S, B, I)
    x_tm = jnp.pad(x_tm, ((0, 0), (0, BP - B), (0, 0)))      # (S, BP, I)
    x2d = x_tm.reshape(S * BP, I)                            # (S*BP, I)

    vmem = pl.BlockSpec(memory_space=pltpu.MemorySpace.VMEM)

    out = pl.pallas_call(
        lstm_seq_kernel,
        out_shape=jax.ShapeDtypeStruct((BP, 4 * H), jnp.float32),
        in_specs=[vmem] * 7,
        out_specs=vmem,
    )(x2d, wih0, whh0, b0, wih1, whh1, b1)

    # Wrapper-side unpack: drop padded batch rows, split [h0|h1|c0|c1].
    out = out[:B]                                            # (B, 4H)
    h = jnp.stack([out[:, 0 * H:1 * H], out[:, 1 * H:2 * H]], axis=0)
    c = jnp.stack([out[:, 2 * H:3 * H], out[:, 3 * H:4 * H]], axis=0)
    return h, c


def rnn_serial_reference(x, params):
    """Plain-JAX reference with identical semantics (for verification)."""
    B, S, I = x.shape
    wih0, whh0, b0, wih1, whh1, b1 = params
    H = whh0.shape[0]

    def gates_ref(inp, h_prev, c_prev, wih, whh, b):
        gates = inp @ wih + h_prev @ whh + b
        i = jax.nn.sigmoid(gates[:, 0 * H:1 * H])
        f = jax.nn.sigmoid(gates[:, 1 * H:2 * H])
        g = jnp.tanh(gates[:, 2 * H:3 * H])
        o = jax.nn.sigmoid(gates[:, 3 * H:4 * H])
        c_new = f * c_prev + i * g
        h_new = o * jnp.tanh(c_new)
        return h_new, c_new

    h = jnp.zeros((NUM_LAYERS, B, H), jnp.float32)
    c = jnp.zeros((NUM_LAYERS, B, H), jnp.float32)
    layer_params = ((wih0, whh0, b0), (wih1, whh1, b1))
    for t in range(S):
        inp = x[:, t, :]
        h_list, c_list = [], []
        for l, (wih, whh, b) in enumerate(layer_params):
            h_new, c_new = gates_ref(inp, h[l], c[l], wih, whh, b)
            h_list.append(h_new)
            c_list.append(c_new)
            inp = h_new
        h = jnp.stack(h_list)
        c = jnp.stack(c_list)
    return h, c


def init_params(key):
    """Deterministic LSTM parameters (PyTorch-style uniform init).

    Layout: W_ih stored transposed as (in_dim, 4H), W_hh as (H, 4H), bias is
    b_ih + b_hh folded into one (1, 4H) row. Gate order i, f, g, o.
    """
    k = 1.0 / np.sqrt(HIDDEN)
    keys = jax.random.split(key, 6)
    wih0 = jax.random.uniform(keys[0], (INPUT, 4 * HIDDEN), jnp.float32, -k, k)
    whh0 = jax.random.uniform(keys[1], (HIDDEN, 4 * HIDDEN), jnp.float32, -k, k)
    b0 = jax.random.uniform(keys[2], (1, 4 * HIDDEN), jnp.float32, -k, k)
    wih1 = jax.random.uniform(keys[3], (HIDDEN, 4 * HIDDEN), jnp.float32, -k, k)
    whh1 = jax.random.uniform(keys[4], (HIDDEN, 4 * HIDDEN), jnp.float32, -k, k)
    b1 = jax.random.uniform(keys[5], (1, 4 * HIDDEN), jnp.float32, -k, k)
    return (wih0, whh0, b0, wih1, whh1, b1)


if __name__ == "__main__":
    key = jax.random.PRNGKey(0)
    kx, kp = jax.random.split(key)
    x = jax.random.normal(kx, (BATCH, SEQ, INPUT), jnp.float32)
    params = init_params(kp)

    h, c = rnn_serial_forward(x, params)
    jax.block_until_ready((h, c))

    h_ref, c_ref = rnn_serial_reference(x, params)
    np.testing.assert_allclose(np.asarray(h), np.asarray(h_ref),
                               rtol=1e-5, atol=1e-5)
    np.testing.assert_allclose(np.asarray(c), np.asarray(c_ref),
                               rtol=1e-5, atol=1e-5)

    # TODO(synk): if RNN_Serial is called repeatedly over MGRIT time chunks,
    # fuse multiple chunks per pallas_call / keep weights resident across
    # calls (cross-call prefetch) — per-call overhead dominates at this size.
    print("KERNEL_OK")
</pallas_src>

<mosaic_0001>
module attributes {stable_mosaic.version = 11 : i64} {
  func.func @lstm_seq_kernel(%arg0: memref<64x16xf32, #tpu.memory_space<vmem>>, %arg1: memref<16x128xf32, #tpu.memory_space<vmem>>, %arg2: memref<32x128xf32, #tpu.memory_space<vmem>>, %arg3: memref<1x128xf32, #tpu.memory_space<vmem>>, %arg4: memref<32x128xf32, #tpu.memory_space<vmem>>, %arg5: memref<32x128xf32, #tpu.memory_space<vmem>>, %arg6: memref<1x128xf32, #tpu.memory_space<vmem>>, %arg7: memref<8x128xf32, #tpu.memory_space<vmem>>) attributes {dimension_semantics = [], scalar_prefetch = 0 : i64, scratch_operands = 0 : i64, tpu.core_type = #tpu.core_type<tc>} {
    %c0 = arith.constant 0 : index
    %c0_0 = arith.constant 0 : index
    %0 = vector.load %arg0[%c0, %c0_0] : memref<64x16xf32, #tpu.memory_space<vmem>>, vector<64x16xf32>
    %c0_1 = arith.constant 0 : index
    %c0_2 = arith.constant 0 : index
    %1 = vector.load %arg1[%c0_1, %c0_2] : memref<16x128xf32, #tpu.memory_space<vmem>>, vector<16x128xf32>
    %cst = arith.constant dense<0.000000e+00> : vector<64x128xf32>
    %2 = tpu.matmul %0, %1, %cst {dimension_numbers = #tpu.dot_dimension_numbers<[1], [0], [0], [1], [0, 0, 1, 1], [], []>} : vector<64x16xf32>, vector<16x128xf32>, vector<64x128xf32> -> vector<64x128xf32>
    %c0_3 = arith.constant 0 : index
    %c0_4 = arith.constant 0 : index
    %3 = vector.load %arg3[%c0_3, %c0_4] : memref<1x128xf32, #tpu.memory_space<vmem>>, vector<1x128xf32>
    %4 = vector.broadcast %3 : vector<1x128xf32> to vector<64x128xf32>
    %5 = arith.addf %2, %4 : vector<64x128xf32>
    %c0_5 = arith.constant 0 : index
    %c0_6 = arith.constant 0 : index
    %6 = vector.load %arg2[%c0_5, %c0_6] : memref<32x128xf32, #tpu.memory_space<vmem>>, vector<32x128xf32>
    %c0_7 = arith.constant 0 : index
    %c0_8 = arith.constant 0 : index
    %7 = vector.load %arg4[%c0_7, %c0_8] : memref<32x128xf32, #tpu.memory_space<vmem>>, vector<32x128xf32>
    %c0_9 = arith.constant 0 : index
    %c0_10 = arith.constant 0 : index
    %8 = vector.load %arg5[%c0_9, %c0_10] : memref<32x128xf32, #tpu.memory_space<vmem>>, vector<32x128xf32>
    %c0_11 = arith.constant 0 : index
    %c0_12 = arith.constant 0 : index
    %9 = vector.load %arg6[%c0_11, %c0_12] : memref<1x128xf32, #tpu.memory_space<vmem>>, vector<1x128xf32>
    %10 = vector.shape_cast %9 : vector<1x128xf32> to vector<1x128xf32>
    %11 = vector.broadcast %10 : vector<1x128xf32> to vector<8x128xf32>
    %cst_13 = arith.constant 0.000000e+00 : f32
    %12 = vector.broadcast %cst_13 : f32 to vector<8x32xf32>
    %cst_14 = arith.constant 0.000000e+00 : f32
    %13 = vector.broadcast %cst_14 : f32 to vector<8x32xf32>
    %cst_15 = arith.constant 0.000000e+00 : f32
    %14 = vector.broadcast %cst_15 : f32 to vector<8x32xf32>
    %cst_16 = arith.constant 0.000000e+00 : f32
    %15 = vector.broadcast %cst_16 : f32 to vector<8x32xf32>
    %16 = vector.extract_strided_slice %5 {offsets = [0, 0], sizes = [8, 128], strides = [1, 1]} : vector<64x128xf32> to vector<8x128xf32>
    %cst_17 = arith.constant dense<0.000000e+00> : vector<8x128xf32>
    %17 = tpu.matmul %12, %6, %cst_17 {dimension_numbers = #tpu.dot_dimension_numbers<[1], [0], [0], [1], [0, 0, 1, 1], [], []>} : vector<8x32xf32>, vector<32x128xf32>, vector<8x128xf32> -> vector<8x128xf32>
    %18 = arith.addf %16, %17 : vector<8x128xf32>
    %19 = arith.negf %18 : vector<8x128xf32>
    %20 = math.exp %19 : vector<8x128xf32>
    %cst_18 = arith.constant 1.000000e+00 : f32
    %21 = vector.broadcast %cst_18 : f32 to vector<8x128xf32>
    %22 = arith.addf %21, %20 : vector<8x128xf32>
    %23 = arith.divf %21, %22 : vector<8x128xf32>
    %24 = math.tanh %18 : vector<8x128xf32>
    %25 = vector.extract_strided_slice %23 {offsets = [0, 0], sizes = [8, 32], strides = [1, 1]} : vector<8x128xf32> to vector<8x32xf32>
    %26 = vector.extract_strided_slice %23 {offsets = [0, 32], sizes = [8, 32], strides = [1, 1]} : vector<8x128xf32> to vector<8x32xf32>
    %27 = vector.extract_strided_slice %24 {offsets = [0, 64], sizes = [8, 32], strides = [1, 1]} : vector<8x128xf32> to vector<8x32xf32>
    %28 = vector.extract_strided_slice %23 {offsets = [0, 96], sizes = [8, 32], strides = [1, 1]} : vector<8x128xf32> to vector<8x32xf32>
    %29 = arith.mulf %26, %13 : vector<8x32xf32>
    %30 = arith.mulf %25, %27 : vector<8x32xf32>
    %31 = arith.addf %29, %30 : vector<8x32xf32>
    %32 = math.tanh %31 : vector<8x32xf32>
    %33 = arith.mulf %28, %32 : vector<8x32xf32>
    %cst_19 = arith.constant dense<0.000000e+00> : vector<8x128xf32>
    %34 = tpu.matmul %33, %7, %cst_19 {dimension_numbers = #tpu.dot_dimension_numbers<[1], [0], [0], [1], [0, 0, 1, 1], [], []>} : vector<8x32xf32>, vector<32x128xf32>, vector<8x128xf32> -> vector<8x128xf32>
    %cst_20 = arith.constant dense<0.000000e+00> : vector<8x128xf32>
    %35 = tpu.matmul %14, %8, %cst_20 {dimension_numbers = #tpu.dot_dimension_numbers<[1], [0], [0], [1], [0, 0, 1, 1], [], []>} : vector<8x32xf32>, vector<32x128xf32>, vector<8x128xf32> -> vector<8x128xf32>
    %36 = arith.addf %34, %35 : vector<8x128xf32>
    %37 = arith.addf %36, %11 : vector<8x128xf32>
    %38 = arith.negf %37 : vector<8x128xf32>
    %39 = math.exp %38 : vector<8x128xf32>
    %cst_21 = arith.constant 1.000000e+00 : f32
    %40 = vector.broadcast %cst_21 : f32 to vector<8x128xf32>
    %41 = arith.addf %40, %39 : vector<8x128xf32>
    %42 = arith.divf %40, %41 : vector<8x128xf32>
    %43 = math.tanh %37 : vector<8x128xf32>
    %44 = vector.extract_strided_slice %42 {offsets = [0, 0], sizes = [8, 32], strides = [1, 1]} : vector<8x128xf32> to vector<8x32xf32>
    %45 = vector.extract_strided_slice %42 {offsets = [0, 32], sizes = [8, 32], strides = [1, 1]} : vector<8x128xf32> to vector<8x32xf32>
    %46 = vector.extract_strided_slice %43 {offsets = [0, 64], sizes = [8, 32], strides = [1, 1]} : vector<8x128xf32> to vector<8x32xf32>
    %47 = vector.extract_strided_slice %42 {offsets = [0, 96], sizes = [8, 32], strides = [1, 1]} : vector<8x128xf32> to vector<8x32xf32>
    %48 = arith.mulf %45, %15 : vector<8x32xf32>
    %49 = arith.mulf %44, %46 : vector<8x32xf32>
    %50 = arith.addf %48, %49 : vector<8x32xf32>
    %51 = math.tanh %50 : vector<8x32xf32>
    %52 = arith.mulf %47, %51 : vector<8x32xf32>
    %53 = vector.extract_strided_slice %5 {offsets = [8, 0], sizes = [8, 128], strides = [1, 1]} : vector<64x128xf32> to vector<8x128xf32>
    %cst_22 = arith.constant dense<0.000000e+00> : vector<8x128xf32>
    %54 = tpu.matmul %33, %6, %cst_22 {dimension_numbers = #tpu.dot_dimension_numbers<[1], [0], [0], [1], [0, 0, 1, 1], [], []>} : vector<8x32xf32>, vector<32x128xf32>, vector<8x128xf32> -> vector<8x128xf32>
    %55 = arith.addf %53, %54 : vector<8x128xf32>
    %56 = arith.negf %55 : vector<8x128xf32>
    %57 = math.exp %56 : vector<8x128xf32>
    %cst_23 = arith.constant 1.000000e+00 : f32
    %58 = vector.broadcast %cst_23 : f32 to vector<8x128xf32>
    %59 = arith.addf %58, %57 : vector<8x128xf32>
    %60 = arith.divf %58, %59 : vector<8x128xf32>
    %61 = math.tanh %55 : vector<8x128xf32>
    %62 = vector.extract_strided_slice %60 {offsets = [0, 0], sizes = [8, 32], strides = [1, 1]} : vector<8x128xf32> to vector<8x32xf32>
    %63 = vector.extract_strided_slice %60 {offsets = [0, 32], sizes = [8, 32], strides = [1, 1]} : vector<8x128xf32> to vector<8x32xf32>
    %64 = vector.extract_strided_slice %61 {offsets = [0, 64], sizes = [8, 32], strides = [1, 1]} : vector<8x128xf32> to vector<8x32xf32>
    %65 = vector.extract_strided_slice %60 {offsets = [0, 96], sizes = [8, 32], strides = [1, 1]} : vector<8x128xf32> to vector<8x32xf32>
    %66 = arith.mulf %63, %31 : vector<8x32xf32>
    %67 = arith.mulf %62, %64 : vector<8x32xf32>
    %68 = arith.addf %66, %67 : vector<8x32xf32>
    %69 = math.tanh %68 : vector<8x32xf32>
    %70 = arith.mulf %65, %69 : vector<8x32xf32>
    %cst_24 = arith.constant dense<0.000000e+00> : vector<8x128xf32>
    %71 = tpu.matmul %70, %7, %cst_24 {dimension_numbers = #tpu.dot_dimension_numbers<[1], [0], [0], [1], [0, 0, 1, 1], [], []>} : vector<8x32xf32>, vector<32x128xf32>, vector<8x128xf32> -> vector<8x128xf32>
    %cst_25 = arith.constant dense<0.000000e+00> : vector<8x128xf32>
    %72 = tpu.matmul %52, %8, %cst_25 {dimension_numbers = #tpu.dot_dimension_numbers<[1], [0], [0], [1], [0, 0, 1, 1], [], []>} : vector<8x32xf32>, vector<32x128xf32>, vector<8x128xf32> -> vector<8x128xf32>
    %73 = arith.addf %71, %72 : vector<8x128xf32>
    %74 = arith.addf %73, %11 : vector<8x128xf32>
    %75 = arith.negf %74 : vector<8x128xf32>
    %76 = math.exp %75 : vector<8x128xf32>
    %cst_26 = arith.constant 1.000000e+00 : f32
    %77 = vector.broadcast %cst_26 : f32 to vector<8x128xf32>
    %78 = arith.addf %77, %76 : vector<8x128xf32>
    %79 = arith.divf %77, %78 : vector<8x128xf32>
    %80 = math.tanh %74 : vector<8x128xf32>
    %81 = vector.extract_strided_slice %79 {offsets = [0, 0], sizes = [8, 32], strides = [1, 1]} : vector<8x128xf32> to vector<8x32xf32>
    %82 = vector.extract_strided_slice %79 {offsets = [0, 32], sizes = [8, 32], strides = [1, 1]} : vector<8x128xf32> to vector<8x32xf32>
    %83 = vector.extract_strided_slice %80 {offsets = [0, 64], sizes = [8, 32], strides = [1, 1]} : vector<8x128xf32> to vector<8x32xf32>
    %84 = vector.extract_strided_slice %79 {offsets = [0, 96], sizes = [8, 32], strides = [1, 1]} : vector<8x128xf32> to vector<8x32xf32>
    %85 = arith.mulf %82, %50 : vector<8x32xf32>
    %86 = arith.mulf %81, %83 : vector<8x32xf32>
    %87 = arith.addf %85, %86 : vector<8x32xf32>
    %88 = math.tanh %87 : vector<8x32xf32>
    %89 = arith.mulf %84, %88 : vector<8x32xf32>
    %90 = vector.extract_strided_slice %5 {offsets = [16, 0], sizes = [8, 128], strides = [1, 1]} : vector<64x128xf32> to vector<8x128xf32>
    %cst_27 = arith.constant dense<0.000000e+00> : vector<8x128xf32>
    %91 = tpu.matmul %70, %6, %cst_27 {dimension_numbers = #tpu.dot_dimension_numbers<[1], [0], [0], [1], [0, 0, 1, 1], [], []>} : vector<8x32xf32>, vector<32x128xf32>, vector<8x128xf32> -> vector<8x128xf32>
    %92 = arith.addf %90, %91 : vector<8x128xf32>
    %93 = arith.negf %92 : vector<8x128xf32>
    %94 = math.exp %93 : vector<8x128xf32>
    %cst_28 = arith.constant 1.000000e+00 : f32
    %95 = vector.broadcast %cst_28 : f32 to vector<8x128xf32>
    %96 = arith.addf %95, %94 : vector<8x128xf32>
    %97 = arith.divf %95, %96 : vector<8x128xf32>
    %98 = math.tanh %92 : vector<8x128xf32>
    %99 = vector.extract_strided_slice %97 {offsets = [0, 0], sizes = [8, 32], strides = [1, 1]} : vector<8x128xf32> to vector<8x32xf32>
    %100 = vector.extract_strided_slice %97 {offsets = [0, 32], sizes = [8, 32], strides = [1, 1]} : vector<8x128xf32> to vector<8x32xf32>
    %101 = vector.extract_strided_slice %98 {offsets = [0, 64], sizes = [8, 32], strides = [1, 1]} : vector<8x128xf32> to vector<8x32xf32>
    %102 = vector.extract_strided_slice %97 {offsets = [0, 96], sizes = [8, 32], strides = [1, 1]} : vector<8x128xf32> to vector<8x32xf32>
    %103 = arith.mulf %100, %68 : vector<8x32xf32>
    %104 = arith.mulf %99, %101 : vector<8x32xf32>
    %105 = arith.addf %103, %104 : vector<8x32xf32>
    %106 = math.tanh %105 : vector<8x32xf32>
    %107 = arith.mulf %102, %106 : vector<8x32xf32>
    %cst_29 = arith.constant dense<0.000000e+00> : vector<8x128xf32>
    %108 = tpu.matmul %107, %7, %cst_29 {dimension_numbers = #tpu.dot_dimension_numbers<[1], [0], [0], [1], [0, 0, 1, 1], [], []>} : vector<8x32xf32>, vector<32x128xf32>, vector<8x128xf32> -> vector<8x128xf32>
    %cst_30 = arith.constant dense<0.000000e+00> : vector<8x128xf32>
    %109 = tpu.matmul %89, %8, %cst_30 {dimension_numbers = #tpu.dot_dimension_numbers<[1], [0], [0], [1], [0, 0, 1, 1], [], []>} : vector<8x32xf32>, vector<32x128xf32>, vector<8x128xf32> -> vector<8x128xf32>
    %110 = arith.addf %108, %109 : vector<8x128xf32>
    %111 = arith.addf %110, %11 : vector<8x128xf32>
    %112 = arith.negf %111 : vector<8x128xf32>
    %113 = math.exp %112 : vector<8x128xf32>
    %cst_31 = arith.constant 1.000000e+00 : f32
    %114 = vector.broadcast %cst_31 : f32 to vector<8x128xf32>
    %115 = arith.addf %114, %113 : vector<8x128xf32>
    %116 = arith.divf %114, %115 : vector<8x128xf32>
    %117 = math.tanh %111 : vector<8x128xf32>
    %118 = vector.extract_strided_slice %116 {offsets = [0, 0], sizes = [8, 32], strides = [1, 1]} : vector<8x128xf32> to vector<8x32xf32>
    %119 = vector.extract_strided_slice %116 {offsets = [0, 32], sizes = [8, 32], strides = [1, 1]} : vector<8x128xf32> to vector<8x32xf32>
    %120 = vector.extract_strided_slice %117 {offsets = [0, 64], sizes = [8, 32], strides = [1, 1]} : vector<8x128xf32> to vector<8x32xf32>
    %121 = vector.extract_strided_slice %116 {offsets = [0, 96], sizes = [8, 32], strides = [1, 1]} : vector<8x128xf32> to vector<8x32xf32>
    %122 = arith.mulf %119, %87 : vector<8x32xf32>
    %123 = arith.mulf %118, %120 : vector<8x32xf32>
    %124 = arith.addf %122, %123 : vector<8x32xf32>
    %125 = math.tanh %124 : vector<8x32xf32>
    %126 = arith.mulf %121, %125 : vector<8x32xf32>
    %127 = vector.extract_strided_slice %5 {offsets = [24, 0], sizes = [8, 128], strides = [1, 1]} : vector<64x128xf32> to vector<8x128xf32>
    %cst_32 = arith.constant dense<0.000000e+00> : vector<8x128xf32>
    %128 = tpu.matmul %107, %6, %cst_32 {dimension_numbers = #tpu.dot_dimension_numbers<[1], [0], [0], [1], [0, 0, 1, 1], [], []>} : vector<8x32xf32>, vector<32x128xf32>, vector<8x128xf32> -> vector<8x128xf32>
    %129 = arith.addf %127, %128 : vector<8x128xf32>
    %130 = arith.negf %129 : vector<8x128xf32>
    %131 = math.exp %130 : vector<8x128xf32>
    %cst_33 = arith.constant 1.000000e+00 : f32
    %132 = vector.broadcast %cst_33 : f32 to vector<8x128xf32>
    %133 = arith.addf %132, %131 : vector<8x128xf32>
    %134 = arith.divf %132, %133 : vector<8x128xf32>
    %135 = math.tanh %129 : vector<8x128xf32>
    %136 = vector.extract_strided_slice %134 {offsets = [0, 0], sizes = [8, 32], strides = [1, 1]} : vector<8x128xf32> to vector<8x32xf32>
    %137 = vector.extract_strided_slice %134 {offsets = [0, 32], sizes = [8, 32], strides = [1, 1]} : vector<8x128xf32> to vector<8x32xf32>
    %138 = vector.extract_strided_slice %135 {offsets = [0, 64], sizes = [8, 32], strides = [1, 1]} : vector<8x128xf32> to vector<8x32xf32>
    %139 = vector.extract_strided_slice %134 {offsets = [0, 96], sizes = [8, 32], strides = [1, 1]} : vector<8x128xf32> to vector<8x32xf32>
    %140 = arith.mulf %137, %105 : vector<8x32xf32>
    %141 = arith.mulf %136, %138 : vector<8x32xf32>
    %142 = arith.addf %140, %141 : vector<8x32xf32>
    %143 = math.tanh %142 : vector<8x32xf32>
    %144 = arith.mulf %139, %143 : vector<8x32xf32>
    %cst_34 = arith.constant dense<0.000000e+00> : vector<8x128xf32>
    %145 = tpu.matmul %144, %7, %cst_34 {dimension_numbers = #tpu.dot_dimension_numbers<[1], [0], [0], [1], [0, 0, 1, 1], [], []>} : vector<8x32xf32>, vector<32x128xf32>, vector<8x128xf32> -> vector<8x128xf32>
    %cst_35 = arith.constant dense<0.000000e+00> : vector<8x128xf32>
    %146 = tpu.matmul %126, %8, %cst_35 {dimension_numbers = #tpu.dot_dimension_numbers<[1], [0], [0], [1], [0, 0, 1, 1], [], []>} : vector<8x32xf32>, vector<32x128xf32>, vector<8x128xf32> -> vector<8x128xf32>
    %147 = arith.addf %145, %146 : vector<8x128xf32>
    %148 = arith.addf %147, %11 : vector<8x128xf32>
    %149 = arith.negf %148 : vector<8x128xf32>
    %150 = math.exp %149 : vector<8x128xf32>
    %cst_36 = arith.constant 1.000000e+00 : f32
    %151 = vector.broadcast %cst_36 : f32 to vector<8x128xf32>
    %152 = arith.addf %151, %150 : vector<8x128xf32>
    %153 = arith.divf %151, %152 : vector<8x128xf32>
    %154 = math.tanh %148 : vector<8x128xf32>
    %155 = vector.extract_strided_slice %153 {offsets = [0, 0], sizes = [8, 32], strides = [1, 1]} : vector<8x128xf32> to vector<8x32xf32>
    %156 = vector.extract_strided_slice %153 {offsets = [0, 32], sizes = [8, 32], strides = [1, 1]} : vector<8x128xf32> to vector<8x32xf32>
    %157 = vector.extract_strided_slice %154 {offsets = [0, 64], sizes = [8, 32], strides = [1, 1]} : vector<8x128xf32> to vector<8x32xf32>
    %158 = vector.extract_strided_slice %153 {offsets = [0, 96], sizes = [8, 32], strides = [1, 1]} : vector<8x128xf32> to vector<8x32xf32>
    %159 = arith.mulf %156, %124 : vector<8x32xf32>
    %160 = arith.mulf %155, %157 : vector<8x32xf32>
    %161 = arith.addf %159, %160 : vector<8x32xf32>
    %162 = math.tanh %161 : vector<8x32xf32>
    %163 = arith.mulf %158, %162 : vector<8x32xf32>
    %164 = vector.extract_strided_slice %5 {offsets = [32, 0], sizes = [8, 128], strides = [1, 1]} : vector<64x128xf32> to vector<8x128xf32>
    %cst_37 = arith.constant dense<0.000000e+00> : vector<8x128xf32>
    %165 = tpu.matmul %144, %6, %cst_37 {dimension_numbers = #tpu.dot_dimension_numbers<[1], [0], [0], [1], [0, 0, 1, 1], [], []>} : vector<8x32xf32>, vector<32x128xf32>, vector<8x128xf32> -> vector<8x128xf32>
    %166 = arith.addf %164, %165 : vector<8x128xf32>
    %167 = arith.negf %166 : vector<8x128xf32>
    %168 = math.exp %167 : vector<8x128xf32>
    %cst_38 = arith.constant 1.000000e+00 : f32
    %169 = vector.broadcast %cst_38 : f32 to vector<8x128xf32>
    %170 = arith.addf %169, %168 : vector<8x128xf32>
    %171 = arith.divf %169, %170 : vector<8x128xf32>
    %172 = math.tanh %166 : vector<8x128xf32>
    %173 = vector.extract_strided_slice %171 {offsets = [0, 0], sizes = [8, 32], strides = [1, 1]} : vector<8x128xf32> to vector<8x32xf32>
    %174 = vector.extract_strided_slice %171 {offsets = [0, 32], sizes = [8, 32], strides = [1, 1]} : vector<8x128xf32> to vector<8x32xf32>
    %175 = vector.extract_strided_slice %172 {offsets = [0, 64], sizes = [8, 32], strides = [1, 1]} : vector<8x128xf32> to vector<8x32xf32>
    %176 = vector.extract_strided_slice %171 {offsets = [0, 96], sizes = [8, 32], strides = [1, 1]} : vector<8x128xf32> to vector<8x32xf32>
    %177 = arith.mulf %174, %142 : vector<8x32xf32>
    %178 = arith.mulf %173, %175 : vector<8x32xf32>
    %179 = arith.addf %177, %178 : vector<8x32xf32>
    %180 = math.tanh %179 : vector<8x32xf32>
    %181 = arith.mulf %176, %180 : vector<8x32xf32>
    %cst_39 = arith.constant dense<0.000000e+00> : vector<8x128xf32>
    %182 = tpu.matmul %181, %7, %cst_39 {dimension_numbers = #tpu.dot_dimension_numbers<[1], [0], [0], [1], [0, 0, 1, 1], [], []>} : vector<8x32xf32>, vector<32x128xf32>, vector<8x128xf32> -> vector<8x128xf32>
    %cst_40 = arith.constant dense<0.000000e+00> : vector<8x128xf32>
    %183 = tpu.matmul %163, %8, %cst_40 {dimension_numbers = #tpu.dot_dimension_numbers<[1], [0], [0], [1], [0, 0, 1, 1], [], []>} : vector<8x32xf32>, vector<32x128xf32>, vector<8x128xf32> -> vector<8x128xf32>
    %184 = arith.addf %182, %183 : vector<8x128xf32>
    %185 = arith.addf %184, %11 : vector<8x128xf32>
    %186 = arith.negf %185 : vector<8x128xf32>
    %187 = math.exp %186 : vector<8x128xf32>
    %cst_41 = arith.constant 1.000000e+00 : f32
    %188 = vector.broadcast %cst_41 : f32 to vector<8x128xf32>
    %189 = arith.addf %188, %187 : vector<8x128xf32>
    %190 = arith.divf %188, %189 : vector<8x128xf32>
    %191 = math.tanh %185 : vector<8x128xf32>
    %192 = vector.extract_strided_slice %190 {offsets = [0, 0], sizes = [8, 32], strides = [1, 1]} : vector<8x128xf32> to vector<8x32xf32>
    %193 = vector.extract_strided_slice %190 {offsets = [0, 32], sizes = [8, 32], strides = [1, 1]} : vector<8x128xf32> to vector<8x32xf32>
    %194 = vector.extract_strided_slice %191 {offsets = [0, 64], sizes = [8, 32], strides = [1, 1]} : vector<8x128xf32> to vector<8x32xf32>
    %195 = vector.extract_strided_slice %190 {offsets = [0, 96], sizes = [8, 32], strides = [1, 1]} : vector<8x128xf32> to vector<8x32xf32>
    %196 = arith.mulf %193, %161 : vector<8x32xf32>
    %197 = arith.mulf %192, %194 : vector<8x32xf32>
    %198 = arith.addf %196, %197 : vector<8x32xf32>
    %199 = math.tanh %198 : vector<8x32xf32>
    %200 = arith.mulf %195, %199 : vector<8x32xf32>
    %201 = vector.extract_strided_slice %5 {offsets = [40, 0], sizes = [8, 128], strides = [1, 1]} : vector<64x128xf32> to vector<8x128xf32>
    %cst_42 = arith.constant dense<0.000000e+00> : vector<8x128xf32>
    %202 = tpu.matmul %181, %6, %cst_42 {dimension_numbers = #tpu.dot_dimension_numbers<[1], [0], [0], [1], [0, 0, 1, 1], [], []>} : vector<8x32xf32>, vector<32x128xf32>, vector<8x128xf32> -> vector<8x128xf32>
    %203 = arith.addf %201, %202 : vector<8x128xf32>
    %204 = arith.negf %203 : vector<8x128xf32>
    %205 = math.exp %204 : vector<8x128xf32>
    %cst_43 = arith.constant 1.000000e+00 : f32
    %206 = vector.broadcast %cst_43 : f32 to vector<8x128xf32>
    %207 = arith.addf %206, %205 : vector<8x128xf32>
    %208 = arith.divf %206, %207 : vector<8x128xf32>
    %209 = math.tanh %203 : vector<8x128xf32>
    %210 = vector.extract_strided_slice %208 {offsets = [0, 0], sizes = [8, 32], strides = [1, 1]} : vector<8x128xf32> to vector<8x32xf32>
    %211 = vector.extract_strided_slice %208 {offsets = [0, 32], sizes = [8, 32], strides = [1, 1]} : vector<8x128xf32> to vector<8x32xf32>
    %212 = vector.extract_strided_slice %209 {offsets = [0, 64], sizes = [8, 32], strides = [1, 1]} : vector<8x128xf32> to vector<8x32xf32>
    %213 = vector.extract_strided_slice %208 {offsets = [0, 96], sizes = [8, 32], strides = [1, 1]} : vector<8x128xf32> to vector<8x32xf32>
    %214 = arith.mulf %211, %179 : vector<8x32xf32>
    %215 = arith.mulf %210, %212 : vector<8x32xf32>
    %216 = arith.addf %214, %215 : vector<8x32xf32>
    %217 = math.tanh %216 : vector<8x32xf32>
    %218 = arith.mulf %213, %217 : vector<8x32xf32>
    %cst_44 = arith.constant dense<0.000000e+00> : vector<8x128xf32>
    %219 = tpu.matmul %218, %7, %cst_44 {dimension_numbers = #tpu.dot_dimension_numbers<[1], [0], [0], [1], [0, 0, 1, 1], [], []>} : vector<8x32xf32>, vector<32x128xf32>, vector<8x128xf32> -> vector<8x128xf32>
    %cst_45 = arith.constant dense<0.000000e+00> : vector<8x128xf32>
    %220 = tpu.matmul %200, %8, %cst_45 {dimension_numbers = #tpu.dot_dimension_numbers<[1], [0], [0], [1], [0, 0, 1, 1], [], []>} : vector<8x32xf32>, vector<32x128xf32>, vector<8x128xf32> -> vector<8x128xf32>
    %221 = arith.addf %219, %220 : vector<8x128xf32>
    %222 = arith.addf %221, %11 : vector<8x128xf32>
    %223 = arith.negf %222 : vector<8x128xf32>
    %224 = math.exp %223 : vector<8x128xf32>
    %cst_46 = arith.constant 1.000000e+00 : f32
    %225 = vector.broadcast %cst_46 : f32 to vector<8x128xf32>
    %226 = arith.addf %225, %224 : vector<8x128xf32>
    %227 = arith.divf %225, %226 : vector<8x128xf32>
    %228 = math.tanh %222 : vector<8x128xf32>
    %229 = vector.extract_strided_slice %227 {offsets = [0, 0], sizes = [8, 32], strides = [1, 1]} : vector<8x128xf32> to vector<8x32xf32>
    %230 = vector.extract_strided_slice %227 {offsets = [0, 32], sizes = [8, 32], strides = [1, 1]} : vector<8x128xf32> to vector<8x32xf32>
    %231 = vector.extract_strided_slice %228 {offsets = [0, 64], sizes = [8, 32], strides = [1, 1]} : vector<8x128xf32> to vector<8x32xf32>
    %232 = vector.extract_strided_slice %227 {offsets = [0, 96], sizes = [8, 32], strides = [1, 1]} : vector<8x128xf32> to vector<8x32xf32>
    %233 = arith.mulf %230, %198 : vector<8x32xf32>
    %234 = arith.mulf %229, %231 : vector<8x32xf32>
    %235 = arith.addf %233, %234 : vector<8x32xf32>
    %236 = math.tanh %235 : vector<8x32xf32>
    %237 = arith.mulf %232, %236 : vector<8x32xf32>
    %238 = vector.extract_strided_slice %5 {offsets = [48, 0], sizes = [8, 128], strides = [1, 1]} : vector<64x128xf32> to vector<8x128xf32>
    %cst_47 = arith.constant dense<0.000000e+00> : vector<8x128xf32>
    %239 = tpu.matmul %218, %6, %cst_47 {dimension_numbers = #tpu.dot_dimension_numbers<[1], [0], [0], [1], [0, 0, 1, 1], [], []>} : vector<8x32xf32>, vector<32x128xf32>, vector<8x128xf32> -> vector<8x128xf32>
    %240 = arith.addf %238, %239 : vector<8x128xf32>
    %241 = arith.negf %240 : vector<8x128xf32>
    %242 = math.exp %241 : vector<8x128xf32>
    %cst_48 = arith.constant 1.000000e+00 : f32
    %243 = vector.broadcast %cst_48 : f32 to vector<8x128xf32>
    %244 = arith.addf %243, %242 : vector<8x128xf32>
    %245 = arith.divf %243, %244 : vector<8x128xf32>
    %246 = math.tanh %240 : vector<8x128xf32>
    %247 = vector.extract_strided_slice %245 {offsets = [0, 0], sizes = [8, 32], strides = [1, 1]} : vector<8x128xf32> to vector<8x32xf32>
    %248 = vector.extract_strided_slice %245 {offsets = [0, 32], sizes = [8, 32], strides = [1, 1]} : vector<8x128xf32> to vector<8x32xf32>
    %249 = vector.extract_strided_slice %246 {offsets = [0, 64], sizes = [8, 32], strides = [1, 1]} : vector<8x128xf32> to vector<8x32xf32>
    %250 = vector.extract_strided_slice %245 {offsets = [0, 96], sizes = [8, 32], strides = [1, 1]} : vector<8x128xf32> to vector<8x32xf32>
    %251 = arith.mulf %248, %216 : vector<8x32xf32>
    %252 = arith.mulf %247, %249 : vector<8x32xf32>
    %253 = arith.addf %251, %252 : vector<8x32xf32>
    %254 = math.tanh %253 : vector<8x32xf32>
    %255 = arith.mulf %250, %254 : vector<8x32xf32>
    %cst_49 = arith.constant dense<0.000000e+00> : vector<8x128xf32>
    %256 = tpu.matmul %255, %7, %cst_49 {dimension_numbers = #tpu.dot_dimension_numbers<[1], [0], [0], [1], [0, 0, 1, 1], [], []>} : vector<8x32xf32>, vector<32x128xf32>, vector<8x128xf32> -> vector<8x128xf32>
    %cst_50 = arith.constant dense<0.000000e+00> : vector<8x128xf32>
    %257 = tpu.matmul %237, %8, %cst_50 {dimension_numbers = #tpu.dot_dimension_numbers<[1], [0], [0], [1], [0, 0, 1, 1], [], []>} : vector<8x32xf32>, vector<32x128xf32>, vector<8x128xf32> -> vector<8x128xf32>
    %258 = arith.addf %256, %257 : vector<8x128xf32>
    %259 = arith.addf %258, %11 : vector<8x128xf32>
    %260 = arith.negf %259 : vector<8x128xf32>
    %261 = math.exp %260 : vector<8x128xf32>
    %cst_51 = arith.constant 1.000000e+00 : f32
    %262 = vector.broadcast %cst_51 : f32 to vector<8x128xf32>
    %263 = arith.addf %262, %261 : vector<8x128xf32>
    %264 = arith.divf %262, %263 : vector<8x128xf32>
    %265 = math.tanh %259 : vector<8x128xf32>
    %266 = vector.extract_strided_slice %264 {offsets = [0, 0], sizes = [8, 32], strides = [1, 1]} : vector<8x128xf32> to vector<8x32xf32>
    %267 = vector.extract_strided_slice %264 {offsets = [0, 32], sizes = [8, 32], strides = [1, 1]} : vector<8x128xf32> to vector<8x32xf32>
    %268 = vector.extract_strided_slice %265 {offsets = [0, 64], sizes = [8, 32], strides = [1, 1]} : vector<8x128xf32> to vector<8x32xf32>
    %269 = vector.extract_strided_slice %264 {offsets = [0, 96], sizes = [8, 32], strides = [1, 1]} : vector<8x128xf32> to vector<8x32xf32>
    %270 = arith.mulf %267, %235 : vector<8x32xf32>
    %271 = arith.mulf %266, %268 : vector<8x32xf32>
    %272 = arith.addf %270, %271 : vector<8x32xf32>
    %273 = math.tanh %272 : vector<8x32xf32>
    %274 = arith.mulf %269, %273 : vector<8x32xf32>
    %275 = vector.extract_strided_slice %5 {offsets = [56, 0], sizes = [8, 128], strides = [1, 1]} : vector<64x128xf32> to vector<8x128xf32>
    %cst_52 = arith.constant dense<0.000000e+00> : vector<8x128xf32>
    %276 = tpu.matmul %255, %6, %cst_52 {dimension_numbers = #tpu.dot_dimension_numbers<[1], [0], [0], [1], [0, 0, 1, 1], [], []>} : vector<8x32xf32>, vector<32x128xf32>, vector<8x128xf32> -> vector<8x128xf32>
    %277 = arith.addf %275, %276 : vector<8x128xf32>
    %278 = arith.negf %277 : vector<8x128xf32>
    %279 = math.exp %278 : vector<8x128xf32>
    %cst_53 = arith.constant 1.000000e+00 : f32
    %280 = vector.broadcast %cst_53 : f32 to vector<8x128xf32>
    %281 = arith.addf %280, %279 : vector<8x128xf32>
    %282 = arith.divf %280, %281 : vector<8x128xf32>
    %283 = math.tanh %277 : vector<8x128xf32>
    %284 = vector.extract_strided_slice %282 {offsets = [0, 0], sizes = [8, 32], strides = [1, 1]} : vector<8x128xf32> to vector<8x32xf32>
    %285 = vector.extract_strided_slice %282 {offsets = [0, 32], sizes = [8, 32], strides = [1, 1]} : vector<8x128xf32> to vector<8x32xf32>
    %286 = vector.extract_strided_slice %283 {offsets = [0, 64], sizes = [8, 32], strides = [1, 1]} : vector<8x128xf32> to vector<8x32xf32>
    %287 = vector.extract_strided_slice %282 {offsets = [0, 96], sizes = [8, 32], strides = [1, 1]} : vector<8x128xf32> to vector<8x32xf32>
    %288 = arith.mulf %285, %253 : vector<8x32xf32>
    %289 = arith.mulf %284, %286 : vector<8x32xf32>
    %290 = arith.addf %288, %289 : vector<8x32xf32>
    %291 = math.tanh %290 : vector<8x32xf32>
    %292 = arith.mulf %287, %291 : vector<8x32xf32>
    %cst_54 = arith.constant dense<0.000000e+00> : vector<8x128xf32>
    %293 = tpu.matmul %292, %7, %cst_54 {dimension_numbers = #tpu.dot_dimension_numbers<[1], [0], [0], [1], [0, 0, 1, 1], [], []>} : vector<8x32xf32>, vector<32x128xf32>, vector<8x128xf32> -> vector<8x128xf32>
    %cst_55 = arith.constant dense<0.000000e+00> : vector<8x128xf32>
    %294 = tpu.matmul %274, %8, %cst_55 {dimension_numbers = #tpu.dot_dimension_numbers<[1], [0], [0], [1], [0, 0, 1, 1], [], []>} : vector<8x32xf32>, vector<32x128xf32>, vector<8x128xf32> -> vector<8x128xf32>
    %295 = arith.addf %293, %294 : vector<8x128xf32>
    %296 = arith.addf %295, %11 : vector<8x128xf32>
    %297 = arith.negf %296 : vector<8x128xf32>
    %298 = math.exp %297 : vector<8x128xf32>
    %cst_56 = arith.constant 1.000000e+00 : f32
    %299 = vector.broadcast %cst_56 : f32 to vector<8x128xf32>
    %300 = arith.addf %299, %298 : vector<8x128xf32>
    %301 = arith.divf %299, %300 : vector<8x128xf32>
    %302 = math.tanh %296 : vector<8x128xf32>
    %303 = vector.extract_strided_slice %301 {offsets = [0, 0], sizes = [8, 32], strides = [1, 1]} : vector<8x128xf32> to vector<8x32xf32>
    %304 = vector.extract_strided_slice %301 {offsets = [0, 32], sizes = [8, 32], strides = [1, 1]} : vector<8x128xf32> to vector<8x32xf32>
    %305 = vector.extract_strided_slice %302 {offsets = [0, 64], sizes = [8, 32], strides = [1, 1]} : vector<8x128xf32> to vector<8x32xf32>
    %306 = vector.extract_strided_slice %301 {offsets = [0, 96], sizes = [8, 32], strides = [1, 1]} : vector<8x128xf32> to vector<8x32xf32>
    %307 = arith.mulf %304, %272 : vector<8x32xf32>
    %308 = arith.mulf %303, %305 : vector<8x32xf32>
    %309 = arith.addf %307, %308 : vector<8x32xf32>
    %310 = math.tanh %309 : vector<8x32xf32>
    %311 = arith.mulf %306, %310 : vector<8x32xf32>
    %312 = tpu.concatenate %292, %311, %290, %309 in 1 : vector<8x32xf32>, vector<8x32xf32>, vector<8x32xf32>, vector<8x32xf32> -> vector<8x128xf32>
    %c0_57 = arith.constant 0 : index
    %c0_58 = arith.constant 0 : index
    %313 = vector.load %arg7[%c0_57, %c0_58] : memref<8x128xf32, #tpu.memory_space<vmem>>, vector<8x128xf32>
    tpu.vector_store %arg7[%c0_57, %c0_58], %312 {strides = array<i32>} : memref<8x128xf32, #tpu.memory_space<vmem>>, vector<8x128xf32>,
    return
  }
}

</mosaic_0001>

<bundles_post_ra>
// kernel: tpu_custom_call.1
= control target key start
LH: loop header
LB: loop body
LE: loop exit
PB: predicated region body
PF: predicated region fallthrough
CT: control target
= control target key end

     0   :  { %12 = vsyncpa [#allocation3], 0  ;;  %s3681_s0 = inlined_call_operand.vmem [shape: f32[64,16], index: 0, kind: input, shape index: {}]   ;;  %s3682_s1 = inlined_call_operand.hbm [shape: f32[16,128], index: 1, kind: input, shape index: {}]   ;;  %s3683_s2 = inlined_call_operand.vmem [shape: f32[32,128], index: 2, kind: input, shape index: {}]   ;;  %s3684_s3 = inlined_call_operand.vmem [shape: f32[1,128], index: 3, kind: input, shape index: {}]   ;;  %s3685_s4 = inlined_call_operand.vmem [shape: f32[32,128], index: 4, kind: input, shape index: {}]   ;;  %s3686_s5 = inlined_call_operand.vmem [shape: f32[32,128], index: 5, kind: input, shape index: {}]   ;;  %s3687_s6 = inlined_call_operand.vmem [shape: f32[1,128], index: 6, kind: input, shape index: {}]   ;;  %s3688_s7 = inlined_call_operand.hbm [shape: f32[8,128], index: 7, kind: output, shape index: {}]  }
   0x1   :  { %13 = vsyncpa [#allocation4], 0  ;;  %s3192_s24 = smov [#allocation2]   ;;  %s3144_s28 = scalar_lea.hbm %s3682_s1, 256 }
   0x2   :  { %s21_s25 = sshll.u32 %s3192_s24, 4  ;;  %p3145_p0 = scmp.ne.s32.totalorder %s3682_s1, %s3144_s28  ;;  %s22_s25 = int_to_ptr.vmem [resolvable:$true] %s21_s25 }
   0x3   :  { %p3148_p1 = scmp.lt.u32.totalorder %s3144_s28, %s3682_s1 }
   0x5   :  { %p3150_p2 = pnand %p3148_p1, %p3145_p0 }
   0x7   :  { %3153 = shalt.err (!%p3150_p2)
}
   0x8   :  { %s3154_s10 = scalar_lea.vmem %s22_s25, 256  ;;  %p3159_p4 = scmp.lt.s32.totalorder %s22_s25, %s22_s25 }
   0x9   :  { %p3155_p3 = scmp.ne.s32.totalorder %s22_s25, %s3154_s10  ;;  %p3160_p5 = scmp.lt.s32.totalorder %s3154_s10, %s3154_s10 }
   0xb   :  { %p3161_p6 = por %p3160_p5, %p3159_p4 }
   0xd   :  { %p3162_p7 = pnand %p3161_p6, %p3155_p3 }
   0xf   :  { %3165 = shalt.err (!%p3162_p7)
}
  0x10   :  { %s3193_s11 = smov 128   ;;  %s3194_s12 = smov 8  }
  0x11   :  { %27 = dma.hbm_to_vmem [thread:$0]  %s3682_s1, 256, %s22_s25, [#allocation3], %s3193_s11, %s3193_s11, %s3194_s12  }
  0x12   :  { %3188 = dma.done.wait [#allocation3], 256  }
  0x13   :  { %3189 = vsyncadd [#allocation3], 4294967040  ;;  %v3195_v0 = vmov 0.0|0.0   ;;  %vm3196_vm0 = vmmov 0   ;;  %v3197_v1 = vmov 0.0   ;;  %vm58_vm1 = vcmask 130048  }
  0x14   :  { %2862 = vmatprep.subr.bf16.mxu1 %v3195_v0  ;;  %2602 = vmatprep.mubr.msk.f32.mxu1 %vm3196_vm0, %v3197_v1  ;;  %v49_v2 = vld [vmem:[#allocation2] sm:$0xff]  ;;  %v50_v3 = vld [vmem:[#allocation2 + $0x8] sm:$0xff]  ;;  %v190_v9 = vld [vmem:[%s3683_s2 + $0x10] sm:$0xff]  ;;  %s3198_s27 = smov 64   ;;  %s3199_s28 = smov 32   ;;  %vm207_vm2 = vcmask 261120  }
  0x15   :  { %v188_v4 = vld [vmem:[%s3683_s2] sm:$0xff]  ;;  %v2858_v5 = vpack.c.bf16 %v50_v3, %v49_v2  ;;  %v189_v6 = vld [vmem:[%s3683_s2 + $0x8] sm:$0xff]  ;;  %v191_v10 = vld [vmem:[%s3683_s2 + $0x18] sm:$0xff]  ;;  %vm2380_vm3 = vcmask 523264   ;;  %vm2382_vm4 = vcmask 785408  }
  0x16   :  { %v41_v7 = vld [vmem:[%s3681_s0] sm:$0xff]  ;;  %v3265_v8 = vpack.c.bf16 %v189_v6, %v188_v4  ;;  %v42_v11 = vld [vmem:[%s3681_s0 + $0x8] sm:$0xff]  ;;  %v3278_v12 = vpack.c.bf16 %v191_v10, %v190_v9  ;;  %v43_v35 = vld [vmem:[%s3681_s0 + $0x10] sm:$0xff] }
  0x17   :  { %2582 = vmatprep.mubr.msk.f32.mxu0 %vm58_vm1, %v41_v7  ;;  %2859 = vmatprep.subr.bf16.mxu0 %v2858_v5  ;;  %v3291_v13 = vld [vmem:[%s3684_s3] ss:$0 sm:$0xff]  ;;  %v193_v31 = vld [vmem:[%s3685_s4 + $0x8] sm:$0xff]  ;;  %v44_v36 = vld [vmem:[%s3681_s0 + $0x18] sm:$0xff] }
  0x18   :  { %2864 = vmatpush3.bf16.msra.mxu1 %v3265_v8  ;;  %2861 = vmatpush3.bf16.msra.mxu0 %v2858_v5  ;;  %v192_v30 = vld [vmem:[%s3685_s4] sm:$0xff]  ;;  %v197_v34 = vld [vmem:[%s3686_s5 + $0x8] sm:$0xff]  ;;  %v198_v38 = vld [vmem:[%s3686_s5 + $0x10] sm:$0xff] }
  0x19   :  { %2865 = vmatprep.subr.bf16.mxu1 %v3195_v0  ;;  %2874 = vmatprep.subr.bf16.mxu0 %v3195_v0  ;;  %v196_v32 = vld [vmem:[%s3686_s5] sm:$0xff]  ;;  %v3310_v33 = vpack.c.bf16 %v193_v31, %v192_v30  ;;  %v199_v39 = vld [vmem:[%s3686_s5 + $0x18] sm:$0xff]  ;;  %v194_v41 = vld [vmem:[%s3685_s4 + $0x10] sm:$0xff] }
  0x1a   :  { %v3321_v37 = vpack.c.bf16 %v197_v34, %v196_v32  ;;  %v45_v40 = vld [vmem:[%s3681_s0 + $0x20] sm:$0xff]  ;;  %v195_v42 = vld [vmem:[%s3685_s4 + $0x18] sm:$0xff]  ;;  %v3342_v43 = vpack.c.bf16 %v199_v39, %v198_v38  ;;  %v46_v45 = vld [vmem:[%s3681_s0 + $0x28] sm:$0xff] }
  0x1b   :  { %2583 = vmatmul.mubr.msk.f32.vlgmr.msra.gmra.mrb[0].mxu0 %vm58_vm1, %v42_v11  ;;  %v3344_v44 = vpack.c.bf16 %v195_v42, %v194_v41  ;;  %v47_v46 = vld [vmem:[%s3681_s0 + $0x30] sm:$0xff]  ;;  %v48_v47 = vld [vmem:[%s3681_s0 + $0x38] sm:$0xff]  ;;  %v3407_v61 = vld [vmem:[%s3687_s6] ss:$0 sm:$0xff] }
  0x1c   :  { %2867 = vmatpush3.bf16.msra.mxu1 %v3278_v12  ;;  %2585 = vmatprep.mubr.msk.f32.mxu0 %vm58_vm1, %v43_v35 }
  0x1d   :  { %2868 = vmatprep.subr.bf16.mxu1 %v3195_v0  ;;  %2876 = vmatpush3.bf16.msra.mxu0 %v3310_v33 }
  0x1e   :  { %2877 = vmatprep.subr.bf16.mxu0 %v3195_v0 }
  0x1f   :  { %2603 = vmatmul.mubr.f32.vlgmr.msra.gmra.mrb[0].mxu1 %v3197_v1  ;;  %2586 = vmatmul.mubr.msk.f32.gmra.mrb[2].mxu0 %vm58_vm1, %v44_v36 }
  0x20   :  { %2613 = vmatprep.mubr.msk.f32.mxu1 %vm3196_vm0, %v3197_v1  ;;  %2870 = vmatpush3.bf16.msra.mxu1 %v3321_v37 }
  0x21   :  { %2871 = vmatprep.subr.bf16.mxu1 %v3195_v0  ;;  %2588 = vmatprep.mubr.msk.f32.mxu0 %vm58_vm1, %v45_v40 }
  0x22   :  { %2879 = vmatpush3.bf16.msra.mxu0 %v3344_v44 }
  0x23   :  { %2589 = vmatmul.mubr.msk.f32.gmra.mrb[4].mxu0 %vm58_vm1, %v46_v45  ;;  %2886 = vmatprep.subr.bf16.mxu0 %v3195_v0 }
  0x24   :  { %2873 = vmatpush3.bf16.msra.mxu1 %v3342_v43  ;;  %2591 = vmatprep.mubr.msk.f32.mxu0 %vm58_vm1, %v47_v46 }
  0x25   :  { %2880 = vmatprep.subr.bf16.mxu1 %v3195_v0 }
  0x27   :  { %2614 = vmatmul.mubr.f32.vlgmr.msra.gmra.mrb[2].mxu1 %v3197_v1  ;;  %2592 = vmatmul.mubr.msk.f32.gmra.mrb[6].mxu0 %vm58_vm1, %v48_v47 }
  0x28   :  { %2882 = vmatpush3.bf16.msra.mxu1 %v3265_v8  ;;  %2624 = vmatprep.mubr.msk.f32.mxu0 %vm3196_vm0, %v3197_v1 }
  0x29   :  { %2883 = vmatprep.subr.bf16.mxu1 %v3195_v0  ;;  %2635 = vmatprep.mubr.msk.f32.mxu1 %vm3196_vm0, %v3197_v1 }
  0x2c   :  { %2885 = vmatpush3.bf16.msra.mxu1 %v3278_v12 }
  0x2d   :  { %2892 = vmatprep.subr.bf16.mxu1 %v3195_v0 }
  0xee   :  { %v3293_v14 = vpop.f32.mrb[0].mxu0 }
  0xef   :  { %v149_v15 = vpop.f32.mrb[1].mxu0  ;;  %v155_v60 = vadd.f32 %v3293_v14, %v3291_v13 }
  0xf0   :  { %v150_v16 = vadd.f32 %v3291_v13, %v149_v15 }
  0xf2   :  { %v277_v17 = vpop.f32.mrb[0].mxu1  ;;  %v3376_v51 = vpop.f32.mrb[2].mxu0 }
  0xf3   :  { %v281_v18 = vadd.f32 %v277_v17, %v150_v16  ;;  %v2604_v19 = vpop.f32.mrb[1].mxu1  ;;  %v3378_v52 = vpop.f32.mrb[3].mxu0 }
  0xf5   :  { %3015 = vtanh.f32 %v281_v18  ;;  %v2410_v21 = vmul.f32 -1.442695, %v281_v18 }
  0xf6   :  { %v3380_v53 = vpop.f32.mrb[4].mxu0 }
  0xf7   :  { %3017 = vpow2.f32 %v2410_v21  ;;  %v3382_v54 = vpop.f32.mrb[5].mxu0 }
  0xfa   :  { %v372_v55 = vpop.f32.mrb[2].mxu1  ;;  %v3384_v56 = vpop.f32.mrb[6].mxu0 }
  0xfb   :  { %v2615_v57 = vpop.f32.mrb[3].mxu1  ;;  %v3386_v58 = vpop.f32.mrb[7].mxu0 }
  0xff   :  { %v3016_v20 = vpop.eup %3015 }
 0x100   :  { %291 = vrot.lane.b32.xlu0 %v3016_v20, %s3198_s27 }
 0x101   :  { %v3018_v22 = vpop.eup %3017 }
 0x102   :  { %v285_v23 = vadd.f32 1.0, %v3018_v22 }
 0x104   :  { %3019 = vrcp.f32 %v285_v23 }
 0x10e   :  { %v3020_v24 = vpop.eup %3019 }
 0x10f   :  { %v289_v27 = vmul.f32 0.0, %v3020_v24 }
 0x172   :  { %v292_v25 = vpop.permute.xlu0 %291 }
 0x173   :  { %v294_v26 = vmul.f32 %v3020_v24, %v292_v25 }
 0x175   :  { %296 = vrot.lane.b32.xlu0 %v294_v26, %s3199_s28 }
 0x1e7   :  { %v297_v28 = vpop.permute.xlu0 %296 }
 0x1e8   :  { %v3298_v29 = vadd.f32 %v297_v28, %v289_v27 }
 0x1ea   :  { %3021 = vtanh.f32 %v3298_v29 }
 0x1f4   :  { %v3022_v48 = vpop.eup %3021 }
 0x1f5   :  { %302 = vrot.lane.b32.xlu1 %v3022_v48, %s3198_s27  ;;  %v160_v48 = vadd.f32 %v3291_v13, %v3378_v52 }
 0x267   :  { %v303_v49 = vpop.permute.xlu1 %302 }
 0x268   :  { %v305_v50 = vmul.f32 %v3020_v24, %v303_v49 }
 0x26a   :  { %377 = vrot.lane.b32.xlu1 %v305_v50, %s3199_s28 }
 0x2dc   :  { %v378_v59 = vpop.permute.xlu1 %377 }
 0x2dd   :  { %2625 = vmatmul.mubr.msk.f32.vlgmr.msra.gmra.mrb[8].mxu0 %vm207_vm2, %v378_v59  ;;  %2636 = vmatmul.mubr.msk.f32.vlgmr.msra.gmra.mrb[4].mxu1 %vm207_vm2, %v378_v59 }
 0x2de   :  { %2894 = vmatpush3.bf16.msra.mxu1 %v3310_v33  ;;  %2888 = vmatpush3.bf16.msra.mxu0 %v3321_v37 }
 0x2df   :  { %2895 = vmatprep.subr.bf16.mxu1 %v3195_v0  ;;  %2889 = vmatprep.subr.bf16.mxu0 %v3195_v0 }
 0x2e0   :  { %2657 = vmatprep.mubr.msk.f32.mxu1 %vm3196_vm0, %v3197_v1  ;;  %2646 = vmatprep.mubr.msk.f32.mxu0 %vm3196_vm0, %v3197_v1 }
 0x2e2   :  { %2897 = vmatpush3.bf16.msra.mxu1 %v3344_v44  ;;  %2891 = vmatpush3.bf16.msra.mxu0 %v3342_v43 }
 0x2e3   :  { %2898 = vmatprep.subr.bf16.mxu0 %v3195_v0  ;;  %2904 = vmatprep.subr.bf16.mxu1 %v3195_v0 }
 0x3b0   :  { %v447_v62 = vpop.f32.mrb[8].mxu0  ;;  %v542_v63 = vpop.f32.mrb[4].mxu1 }
 0x3b1   :  { %v448_v2 = vadd.f32 %v447_v62, %v372_v55  ;;  %v546_v3 = vadd.f32 %v542_v63, %v155_v60  ;;  %v2626_v4 = vpop.f32.mrb[9].mxu0  ;;  %v2637_v5 = vpop.f32.mrb[5].mxu1 }
 0x3b3   :  { %v451_v6 = vadd.f32 %v3407_v61, %v448_v2  ;;  %3023 = vtanh.f32 %v546_v3  ;;  %v2414_v10 = vmul.f32 -1.442695, %v546_v3 }
 0x3b5   :  { %3025 = vtanh.f32 %v451_v6  ;;  %v2412_v11 = vmul.f32 -1.442695, %v451_v6 }
 0x3b6   :  { %3027 = vpow2.f32 %v2414_v10 }
 0x3b7   :  { %3029 = vpow2.f32 %v2412_v11 }
 0x3bd   :  { %v3024_v7 = vpop.eup %3023 }
 0x3be   :  { %556 = vrot.lane.b32.xlu1 %v3024_v7, %s3198_s27 }
 0x3bf   :  { %v3026_v9 = vpop.eup %3025 }
 0x3c0   :  { %461 = vrot.lane.b32.xlu0 %v3026_v9, %s3198_s27  ;;  %v3028_v14 = vpop.eup %3027 }
 0x3c1   :  { %v3030_v15 = vpop.eup %3029  ;;  %v550_v16 = vadd.f32 1.0, %v3028_v14 }
 0x3c2   :  { %v455_v17 = vadd.f32 1.0, %v3030_v15 }
 0x3c3   :  { %3031 = vrcp.f32 %v550_v16 }
 0x3c4   :  { %3033 = vrcp.f32 %v455_v17 }
 0x3cd   :  { %v3032_v18 = vpop.eup %3031 }
 0x3ce   :  { %v3034_v21 = vpop.eup %3033  ;;  %v554_v24 = vmul.f32 %v3032_v18, %v3298_v29 }
 0x3cf   :  { %v459_v27 = vmul.f32 0.0, %v3034_v21 }
 0x430   :  { %v557_v19 = vpop.permute.xlu1 %556 }
 0x431   :  { %v559_v20 = vmul.f32 %v3032_v18, %v557_v19 }
 0x432   :  { %v462_v22 = vpop.permute.xlu0 %461 }
 0x433   :  { %v464_v23 = vmul.f32 %v3034_v21, %v462_v22  ;;  %561 = vrot.lane.b32.xlu1 %v559_v20, %s3199_s28 }
 0x435   :  { %466 = vrot.lane.b32.xlu0 %v464_v23, %s3199_s28 }
 0x4a5   :  { %v562_v25 = vpop.permute.xlu1 %561 }
 0x4a6   :  { %v3415_v26 = vadd.f32 %v562_v25, %v554_v24 }
 0x4a7   :  { %v467_v28 = vpop.permute.xlu0 %466 }
 0x4a8   :  { %3035 = vtanh.f32 %v3415_v26  ;;  %v3418_v30 = vadd.f32 %v467_v28, %v459_v27 }
 0x4aa   :  { %3037 = vtanh.f32 %v3418_v30 }
 0x4b2   :  { %v3036_v31 = vpop.eup %3035 }
 0x4b3   :  { %567 = vrot.lane.b32.xlu1 %v3036_v31, %s3198_s27  ;;  %v165_v31 = vadd.f32 %v3376_v51, %v3291_v13 }
 0x4b4   :  { %v3038_v32 = vpop.eup %3037 }
 0x4b5   :  { %472 = vrot.lane.b32.xlu0 %v3038_v32, %s3198_s27 }
 0x525   :  { %v568_v34 = vpop.permute.xlu1 %567 }
 0x526   :  { %v570_v35 = vmul.f32 %v3032_v18, %v568_v34 }
 0x527   :  { %v473_v29 = vpop.permute.xlu0 %472 }
 0x528   :  { %v475_v36 = vmul.f32 %v3034_v21, %v473_v29  ;;  %647 = vrot.lane.b32.xlu1 %v570_v35, %s3199_s28 }
 0x52a   :  { %572 = vrot.lane.b32.xlu0 %v475_v36, %s3199_s28 }
 0x59a   :  { %v648_v38 = vpop.permute.xlu1 %647 }
 0x59b   :  { %2658 = vmatmul.mubr.msk.f32.vlgmr.msra.gmra.mrb[6].mxu1 %vm207_vm2, %v648_v38 }
 0x59c   :  { %v573_v39 = vpop.permute.xlu0 %572  ;;  %2906 = vmatpush3.bf16.msra.mxu1 %v3321_v37  ;;  %2679 = vmatprep.mubr.msk.f32.mxu1 %vm3196_vm0, %v3197_v1 }
 0x59d   :  { %2647 = vmatmul.mubr.msk.f32.vlgmr.msra.gmra.mrb[10].mxu0 %vm207_vm2, %v573_v39  ;;  %2907 = vmatprep.subr.bf16.mxu1 %v3195_v0 }
 0x59e   :  { %2900 = vmatpush3.bf16.msra.mxu0 %v3265_v8  ;;  %2668 = vmatprep.mubr.msk.f32.mxu0 %vm3196_vm0, %v3197_v1 }
 0x59f   :  { %2901 = vmatprep.subr.bf16.mxu0 %v3195_v0 }
 0x5a0   :  { %2909 = vmatpush3.bf16.msra.mxu1 %v3342_v43 }
 0x5a1   :  { %2916 = vmatprep.subr.bf16.mxu1 %v3195_v0 }
 0x5a2   :  { %2903 = vmatpush3.bf16.msra.mxu0 %v3278_v12 }
 0x5a3   :  { %2910 = vmatprep.subr.bf16.mxu0 %v3195_v0 }
 0x5a5   :  { %2669 = vmatmul.mubr.msk.f32.vlgmr.msra.gmra.mrb[12].mxu0 %vm207_vm2, %v648_v38 }
 0x5a6   :  { %2912 = vmatpush3.bf16.msra.mxu0 %v3310_v33  ;;  %2690 = vmatprep.mubr.msk.f32.mxu0 %vm3196_vm0, %v3197_v1 }
 0x5a7   :  { %2913 = vmatprep.subr.bf16.mxu0 %v3195_v0 }
 0x5aa   :  { %2915 = vmatpush3.bf16.msra.mxu0 %v3344_v44 }
 0x5ab   :  { %2922 = vmatprep.subr.bf16.mxu0 %v3195_v0 }
 0x66e   :  { %v717_v40 = vpop.f32.mrb[6].mxu1 }
 0x66f   :  { %v2659_v41 = vpop.f32.mrb[7].mxu1 }
 0x670   :  { %v642_v42 = vpop.f32.mrb[10].mxu0 }
 0x671   :  { %v718_v45 = vadd.f32 %v717_v40, %v642_v42  ;;  %v2648_v46 = vpop.f32.mrb[11].mxu0 }
 0x673   :  { %v721_v47 = vadd.f32 %v3407_v61, %v718_v45 }
 0x675   :  { %3039 = vtanh.f32 %v721_v47  ;;  %v2417_v60 = vmul.f32 -1.442695, %v721_v47 }
 0x678   :  { %v812_v49 = vpop.f32.mrb[12].mxu0 }
 0x679   :  { %v816_v50 = vadd.f32 %v812_v49, %v160_v48  ;;  %v2670_v55 = vpop.f32.mrb[13].mxu0 }
 0x67b   :  { %3041 = vtanh.f32 %v816_v50  ;;  %v2419_v62 = vmul.f32 -1.442695, %v816_v50 }
 0x67c   :  { %3043 = vpow2.f32 %v2417_v60 }
 0x67d   :  { %3045 = vpow2.f32 %v2419_v62 }
 0x67f   :  { %v3040_v57 = vpop.eup %3039 }
 0x680   :  { %731 = vrot.lane.b32.xlu0 %v3040_v57, %s3198_s27 }
 0x685   :  { %v3042_v59 = vpop.eup %3041 }
 0x686   :  { %826 = vrot.lane.b32.xlu1 %v3042_v59, %s3198_s27  ;;  %v3044_v63 = vpop.eup %3043 }
 0x687   :  { %v725_v2 = vadd.f32 1.0, %v3044_v63  ;;  %v3046_v3 = vpop.eup %3045 }
 0x688   :  { %v820_v4 = vadd.f32 1.0, %v3046_v3 }
 0x689   :  { %3047 = vrcp.f32 %v725_v2 }
 0x68a   :  { %3049 = vrcp.f32 %v820_v4 }
 0x693   :  { %v3048_v52 = vpop.eup %3047 }
 0x694   :  { %v3050_v7 = vpop.eup %3049  ;;  %v729_v11 = vmul.f32 %v3048_v52, %v3418_v30 }
 0x695   :  { %v824_v16 = vmul.f32 %v3050_v7, %v3415_v26 }
 0x6f2   :  { %v732_v5 = vpop.permute.xlu0 %731 }
 0x6f3   :  { %v734_v6 = vmul.f32 %v3048_v52, %v732_v5 }
 0x6f5   :  { %736 = vrot.lane.b32.xlu0 %v734_v6, %s3199_s28 }
 0x6f8   :  { %v827_v9 = vpop.permute.xlu1 %826 }
 0x6f9   :  { %v829_v10 = vmul.f32 %v3050_v7, %v827_v9 }
 0x6fb   :  { %831 = vrot.lane.b32.xlu1 %v829_v10, %s3199_s28 }
 0x767   :  { %v737_v14 = vpop.permute.xlu0 %736 }
 0x768   :  { %v3454_v15 = vadd.f32 %v737_v14, %v729_v11 }
 0x76a   :  { %3051 = vtanh.f32 %v3454_v15 }
 0x76d   :  { %v832_v17 = vpop.permute.xlu1 %831 }
 0x76e   :  { %v3458_v18 = vadd.f32 %v832_v17, %v824_v16 }
 0x770   :  { %3053 = vtanh.f32 %v3458_v18 }
 0x774   :  { %v3052_v19 = vpop.eup %3051 }
 0x775   :  { %742 = vrot.lane.b32.xlu0 %v3052_v19, %s3198_s27 }
 0x77a   :  { %v3054_v20 = vpop.eup %3053 }
 0x77b   :  { %837 = vrot.lane.b32.xlu1 %v3054_v20, %s3198_s27 }
 0x7e7   :  { %v743_v21 = vpop.permute.xlu0 %742 }
 0x7e8   :  { %v745_v22 = vmul.f32 %v3048_v52, %v743_v21  ;;  %v170_v21 = vadd.f32 %v3291_v13, %v3382_v54 }
 0x7ea   :  { %842 = vrot.lane.b32.xlu0 %v745_v22, %s3199_s28 }
 0x7ed   :  { %v838_v23 = vpop.permute.xlu1 %837 }
 0x7ee   :  { %v840_v24 = vmul.f32 %v3050_v7, %v838_v23 }
 0x7f0   :  { %917 = vrot.lane.b32.xlu1 %v840_v24, %s3199_s28 }
 0x85c   :  { %v843_v25 = vpop.permute.xlu0 %842 }
 0x85d   :  { %2680 = vmatmul.mubr.msk.f32.vlgmr.msra.gmra.mrb[8].mxu1 %vm207_vm2, %v843_v25 }
 0x85e   :  { %2918 = vmatpush3.bf16.msra.mxu1 %v3265_v8  ;;  %2701 = vmatprep.mubr.msk.f32.mxu1 %vm3196_vm0, %v3197_v1 }
 0x85f   :  { %2919 = vmatprep.subr.bf16.mxu1 %v3195_v0 }
 0x862   :  { %2921 = vmatpush3.bf16.msra.mxu1 %v3278_v12  ;;  %v918_v26 = vpop.permute.xlu1 %917 }
 0x863   :  { %2691 = vmatmul.mubr.msk.f32.vlgmr.msra.gmra.mrb[14].mxu0 %vm207_vm2, %v918_v26  ;;  %2928 = vmatprep.subr.bf16.mxu1 %v3195_v0 }
 0x864   :  { %2924 = vmatpush3.bf16.msra.mxu0 %v3321_v37  ;;  %2712 = vmatprep.mubr.msk.f32.mxu0 %vm3196_vm0, %v3197_v1 }
 0x865   :  { %2702 = vmatmul.mubr.msk.f32.vlgmr.msra.gmra.mrb[10].mxu1 %vm207_vm2, %v918_v26  ;;  %2925 = vmatprep.subr.bf16.mxu0 %v3195_v0 }
 0x866   :  { %2930 = vmatpush3.bf16.msra.mxu1 %v3310_v33  ;;  %2723 = vmatprep.mubr.msk.f32.mxu1 %vm3196_vm0, %v3197_v1 }
 0x867   :  { %2931 = vmatprep.subr.bf16.mxu1 %v3195_v0 }
 0x868   :  { %2927 = vmatpush3.bf16.msra.mxu0 %v3342_v43 }
 0x869   :  { %2934 = vmatprep.subr.bf16.mxu0 %v3195_v0 }
 0x86a   :  { %2933 = vmatpush3.bf16.msra.mxu1 %v3344_v44 }
 0x86b   :  { %2940 = vmatprep.subr.bf16.mxu1 %v3195_v0 }
 0x930   :  { %v912_v27 = vpop.f32.mrb[8].mxu1 }
 0x931   :  { %v2681_v28 = vpop.f32.mrb[9].mxu1 }
 0x936   :  { %v987_v30 = vpop.f32.mrb[14].mxu0 }
 0x937   :  { %v988_v32 = vadd.f32 %v987_v30, %v912_v27  ;;  %v2692_v34 = vpop.f32.mrb[15].mxu0 }
 0x938   :  { %v1082_v35 = vpop.f32.mrb[10].mxu1 }
 0x939   :  { %v991_v29 = vadd.f32 %v3407_v61, %v988_v32  ;;  %v1086_v36 = vadd.f32 %v1082_v35, %v165_v31  ;;  %v2703_v38 = vpop.f32.mrb[11].mxu1 }
 0x93b   :  { %3055 = vtanh.f32 %v991_v29  ;;  %v2422_v41 = vmul.f32 -1.442695, %v991_v29  ;;  %v2424_v42 = vmul.f32 -1.442695, %v1086_v36 }
 0x93c   :  { %3057 = vtanh.f32 %v1086_v36 }
 0x93d   :  { %3059 = vpow2.f32 %v2422_v41 }
 0x93e   :  { %3061 = vpow2.f32 %v2424_v42 }
 0x945   :  { %v3056_v39 = vpop.eup %3055 }
 0x946   :  { %v3058_v40 = vpop.eup %3057  ;;  %1001 = vrot.lane.b32.xlu0 %v3056_v39, %s3198_s27 }
 0x947   :  { %1096 = vrot.lane.b32.xlu1 %v3058_v40, %s3198_s27  ;;  %v3060_v51 = vpop.eup %3059 }
 0x948   :  { %v3062_v45 = vpop.eup %3061  ;;  %v995_v46 = vadd.f32 1.0, %v3060_v51 }
 0x949   :  { %v1090_v47 = vadd.f32 1.0, %v3062_v45 }
 0x94a   :  { %3063 = vrcp.f32 %v995_v46 }
 0x94b   :  { %3065 = vrcp.f32 %v1090_v47 }
 0x954   :  { %v3064_v48 = vpop.eup %3063 }
 0x955   :  { %v3066_v50 = vpop.eup %3065  ;;  %v999_v60 = vmul.f32 %v3064_v48, %v3454_v15 }
 0x956   :  { %v1094_v62 = vmul.f32 %v3066_v50, %v3458_v18 }
 0x9b8   :  { %v1002_v49 = vpop.permute.xlu0 %1001 }
 0x9b9   :  { %v1097_v55 = vpop.permute.xlu1 %1096  ;;  %v1004_v57 = vmul.f32 %v3064_v48, %v1002_v49 }
 0x9ba   :  { %v1099_v59 = vmul.f32 %v3066_v50, %v1097_v55 }
 0x9bb   :  { %1006 = vrot.lane.b32.xlu0 %v1004_v57, %s3199_s28 }
 0x9bc   :  { %1101 = vrot.lane.b32.xlu1 %v1099_v59, %s3199_s28 }
 0xa2d   :  { %v1007_v63 = vpop.permute.xlu0 %1006 }
 0xa2e   :  { %v1102_v2 = vpop.permute.xlu1 %1101  ;;  %v3495_v3 = vadd.f32 %v1007_v63, %v999_v60 }
 0xa2f   :  { %v3497_v4 = vadd.f32 %v1102_v2, %v1094_v62 }
 0xa30   :  { %3067 = vtanh.f32 %v3495_v3 }
 0xa31   :  { %3069 = vtanh.f32 %v3497_v4 }
 0xa3a   :  { %v3068_v52 = vpop.eup %3067 }
 0xa3b   :  { %v3070_v5 = vpop.eup %3069  ;;  %1012 = vrot.lane.b32.xlu0 %v3068_v52, %s3198_s27  ;;  %v175_v52 = vadd.f32 %v3380_v53, %v3291_v13 }
 0xa3c   :  { %1107 = vrot.lane.b32.xlu1 %v3070_v5, %s3198_s27 }
 0xaad   :  { %v1013_v6 = vpop.permute.xlu0 %1012 }
 0xaae   :  { %v1108_v7 = vpop.permute.xlu1 %1107  ;;  %v1015_v9 = vmul.f32 %v3064_v48, %v1013_v6 }
 0xaaf   :  { %v1110_v10 = vmul.f32 %v3066_v50, %v1108_v7 }
 0xab0   :  { %1112 = vrot.lane.b32.xlu0 %v1015_v9, %s3199_s28 }
 0xab1   :  { %1187 = vrot.lane.b32.xlu1 %v1110_v10, %s3199_s28 }
 0xb22   :  { %v1113_v11 = vpop.permute.xlu0 %1112 }
 0xb23   :  { %v1188_v14 = vpop.permute.xlu1 %1187  ;;  %2713 = vmatmul.mubr.msk.f32.vlgmr.msra.gmra.mrb[16].mxu0 %vm207_vm2, %v1113_v11 }
 0xb24   :  { %2724 = vmatmul.mubr.msk.f32.vlgmr.msra.gmra.mrb[12].mxu1 %vm207_vm2, %v1188_v14  ;;  %2936 = vmatpush3.bf16.msra.mxu0 %v3265_v8 }
 0xb25   :  { %2937 = vmatprep.subr.bf16.mxu0 %v3195_v0  ;;  %2734 = vmatprep.mubr.msk.f32.mxu0 %vm3196_vm0, %v3197_v1 }
 0xb26   :  { %2942 = vmatpush3.bf16.msra.mxu1 %v3321_v37  ;;  %2745 = vmatprep.mubr.msk.f32.mxu1 %vm3196_vm0, %v3197_v1 }
 0xb27   :  { %2943 = vmatprep.subr.bf16.mxu1 %v3195_v0 }
 0xb28   :  { %2939 = vmatpush3.bf16.msra.mxu0 %v3278_v12 }
 0xb29   :  { %2946 = vmatprep.subr.bf16.mxu0 %v3195_v0 }
 0xb2a   :  { %2945 = vmatpush3.bf16.msra.mxu1 %v3342_v43 }
 0xb2b   :  { %2735 = vmatmul.mubr.msk.f32.vlgmr.msra.gmra.mrb[18].mxu0 %vm207_vm2, %v1188_v14  ;;  %2952 = vmatprep.subr.bf16.mxu1 %v3195_v0 }
 0xb2c   :  { %2948 = vmatpush3.bf16.msra.mxu0 %v3310_v33  ;;  %2756 = vmatprep.mubr.msk.f32.mxu0 %vm3196_vm0, %v3197_v1 }
 0xb2d   :  { %2949 = vmatprep.subr.bf16.mxu0 %v3195_v0 }
 0xb30   :  { %2951 = vmatpush3.bf16.msra.mxu0 %v3344_v44 }
 0xb31   :  { %2958 = vmatprep.subr.bf16.mxu0 %v3195_v0 }
 0xbf6   :  { %v1182_v15 = vpop.f32.mrb[16].mxu0 }
 0xbf7   :  { %v1257_v16 = vpop.f32.mrb[12].mxu1  ;;  %v2714_v17 = vpop.f32.mrb[17].mxu0 }
 0xbf8   :  { %v1258_v18 = vadd.f32 %v1257_v16, %v1182_v15  ;;  %v2725_v19 = vpop.f32.mrb[13].mxu1 }
 0xbfa   :  { %v1261_v20 = vadd.f32 %v3407_v61, %v1258_v18 }
 0xbfc   :  { %3071 = vtanh.f32 %v1261_v20  ;;  %v2427_v27 = vmul.f32 -1.442695, %v1261_v20 }
 0xbfe   :  { %v1352_v22 = vpop.f32.mrb[18].mxu0 }
 0xbff   :  { %v1356_v23 = vadd.f32 %v1352_v22, %v170_v21  ;;  %v2736_v24 = vpop.f32.mrb[19].mxu0 }
 0xc01   :  { %3073 = vtanh.f32 %v1356_v23  ;;  %v2429_v28 = vmul.f32 -1.442695, %v1356_v23 }
 0xc02   :  { %3075 = vpow2.f32 %v2427_v27 }
 0xc03   :  { %3077 = vpow2.f32 %v2429_v28 }
 0xc06   :  { %v3072_v25 = vpop.eup %3071 }
 0xc07   :  { %1271 = vrot.lane.b32.xlu0 %v3072_v25, %s3198_s27 }
 0xc0b   :  { %v3074_v26 = vpop.eup %3073 }
 0xc0c   :  { %1366 = vrot.lane.b32.xlu1 %v3074_v26, %s3198_s27  ;;  %v3076_v30 = vpop.eup %3075 }
 0xc0d   :  { %v1265_v31 = vadd.f32 1.0, %v3076_v30  ;;  %v3078_v32 = vpop.eup %3077 }
 0xc0e   :  { %v1360_v34 = vadd.f32 1.0, %v3078_v32 }
 0xc0f   :  { %3079 = vrcp.f32 %v1265_v31 }
 0xc10   :  { %3081 = vrcp.f32 %v1360_v34 }
 0xc19   :  { %v3080_v54 = vpop.eup %3079 }
 0xc1a   :  { %v3082_v36 = vpop.eup %3081  ;;  %v1269_v40 = vmul.f32 %v3080_v54, %v3495_v3 }
 0xc1b   :  { %v1364_v51 = vmul.f32 %v3082_v36, %v3497_v4 }
 0xc79   :  { %v1272_v35 = vpop.permute.xlu0 %1271 }
 0xc7a   :  { %v1274_v29 = vmul.f32 %v3080_v54, %v1272_v35 }
 0xc7c   :  { %1276 = vrot.lane.b32.xlu0 %v1274_v29, %s3199_s28 }
 0xc7e   :  { %v1367_v38 = vpop.permute.xlu1 %1366 }
 0xc7f   :  { %v1369_v39 = vmul.f32 %v3082_v36, %v1367_v38 }
 0xc81   :  { %1371 = vrot.lane.b32.xlu1 %v1369_v39, %s3199_s28 }
 0xcee   :  { %v1277_v41 = vpop.permute.xlu0 %1276 }
 0xcef   :  { %v3534_v42 = vadd.f32 %v1277_v41, %v1269_v40 }
 0xcf1   :  { %3083 = vtanh.f32 %v3534_v42 }
 0xcf3   :  { %v1372_v45 = vpop.permute.xlu1 %1371 }
 0xcf4   :  { %v3538_v46 = vadd.f32 %v1372_v45, %v1364_v51 }
 0xcf6   :  { %3085 = vtanh.f32 %v3538_v46 }
 0xcfb   :  { %v3084_v47 = vpop.eup %3083 }
 0xcfc   :  { %1282 = vrot.lane.b32.xlu0 %v3084_v47, %s3198_s27  ;;  %v180_v47 = vadd.f32 %v3291_v13, %v3386_v58 }
 0xd00   :  { %v3086_v48 = vpop.eup %3085 }
 0xd01   :  { %1377 = vrot.lane.b32.xlu1 %v3086_v48, %s3198_s27 }
 0xd6e   :  { %v1283_v49 = vpop.permute.xlu0 %1282 }
 0xd6f   :  { %v1285_v50 = vmul.f32 %v3080_v54, %v1283_v49 }
 0xd71   :  { %1382 = vrot.lane.b32.xlu0 %v1285_v50, %s3199_s28 }
 0xd73   :  { %v1378_v55 = vpop.permute.xlu1 %1377 }
 0xd74   :  { %v1380_v57 = vmul.f32 %v3082_v36, %v1378_v55 }
 0xd76   :  { %1457 = vrot.lane.b32.xlu1 %v1380_v57, %s3199_s28 }
 0xde3   :  { %v1383_v59 = vpop.permute.xlu0 %1382 }
 0xde4   :  { %2746 = vmatmul.mubr.msk.f32.vlgmr.msra.gmra.mrb[14].mxu1 %vm207_vm2, %v1383_v59 }
 0xde5   :  { %2954 = vmatpush3.bf16.msra.mxu1 %v3265_v8  ;;  %2767 = vmatprep.mubr.msk.f32.mxu1 %vm3196_vm0, %v3197_v1 }
 0xde6   :  { %2955 = vmatprep.subr.bf16.mxu1 %v3195_v0 }
 0xde8   :  { %v1458_v60 = vpop.permute.xlu1 %1457 }
 0xde9   :  { %2957 = vmatpush3.bf16.msra.mxu1 %v3278_v12  ;;  %2757 = vmatmul.mubr.msk.f32.vlgmr.msra.gmra.mrb[20].mxu0 %vm207_vm2, %v1458_v60 }
 0xdea   :  { %2960 = vmatpush3.bf16.msra.mxu0 %v3321_v37  ;;  %2964 = vmatprep.subr.bf16.mxu1 %v3195_v0 }
 0xdeb   :  { %2961 = vmatprep.subr.bf16.mxu0 %v3195_v0  ;;  %2778 = vmatprep.mubr.msk.f32.mxu0 %vm3196_vm0, %v3197_v1 }
 0xdec   :  { %2768 = vmatmul.mubr.msk.f32.vlgmr.msra.gmra.mrb[16].mxu1 %vm207_vm2, %v1458_v60 }
 0xded   :  { %2966 = vmatpush3.bf16.msra.mxu1 %v3310_v33  ;;  %2789 = vmatprep.mubr.msk.f32.mxu1 %vm3196_vm0, %v3197_v1 }
 0xdee   :  { %2963 = vmatpush3.bf16.msra.mxu0 %v3342_v43  ;;  %2967 = vmatprep.subr.bf16.mxu1 %v3195_v0 }
 0xdef   :  { %2970 = vmatprep.subr.bf16.mxu0 %v3195_v0 }
 0xdf1   :  { %2969 = vmatpush3.bf16.msra.mxu1 %v3344_v44 }
 0xdf2   :  { %2976 = vmatprep.subr.bf16.mxu1 %v3195_v0 }
 0xeb7   :  { %v1452_v62 = vpop.f32.mrb[14].mxu1 }
 0xeb8   :  { %v2747_v63 = vpop.f32.mrb[15].mxu1 }
 0xebc   :  { %v1527_v2 = vpop.f32.mrb[20].mxu0 }
 0xebd   :  { %v1528_v3 = vadd.f32 %v1527_v2, %v1452_v62  ;;  %v2758_v4 = vpop.f32.mrb[21].mxu0 }
 0xebf   :  { %v1531_v5 = vadd.f32 %v3407_v61, %v1528_v3  ;;  %v1622_v6 = vpop.f32.mrb[16].mxu1 }
 0xec0   :  { %v1626_v7 = vadd.f32 %v1622_v6, %v175_v52  ;;  %v2769_v9 = vpop.f32.mrb[17].mxu1 }
 0xec1   :  { %3087 = vtanh.f32 %v1531_v5  ;;  %v2432_v14 = vmul.f32 -1.442695, %v1531_v5 }
 0xec2   :  { %3089 = vtanh.f32 %v1626_v7  ;;  %v2434_v15 = vmul.f32 -1.442695, %v1626_v7 }
 0xec3   :  { %3091 = vpow2.f32 %v2432_v14 }
 0xec4   :  { %3093 = vpow2.f32 %v2434_v15 }
 0xecb   :  { %v3088_v10 = vpop.eup %3087 }
 0xecc   :  { %v3090_v11 = vpop.eup %3089  ;;  %1541 = vrot.lane.b32.xlu0 %v3088_v10, %s3198_s27 }
 0xecd   :  { %1636 = vrot.lane.b32.xlu1 %v3090_v11, %s3198_s27  ;;  %v3092_v16 = vpop.eup %3091 }
 0xece   :  { %v3094_v17 = vpop.eup %3093  ;;  %v1535_v53 = vadd.f32 1.0, %v3092_v16 }
 0xecf   :  { %v1630_v18 = vadd.f32 1.0, %v3094_v17 }
 0xed0   :  { %3095 = vrcp.f32 %v1535_v53 }
 0xed1   :  { %3097 = vrcp.f32 %v1630_v18 }
 0xeda   :  { %v3096_v19 = vpop.eup %3095 }
 0xedb   :  { %v3098_v21 = vpop.eup %3097  ;;  %v1539_v25 = vmul.f32 %v3096_v19, %v3534_v42 }
 0xedc   :  { %v1634_v26 = vmul.f32 %v3098_v21, %v3538_v46 }
 0xf3e   :  { %v1542_v20 = vpop.permute.xlu0 %1541 }
 0xf3f   :  { %v1637_v22 = vpop.permute.xlu1 %1636  ;;  %v1544_v23 = vmul.f32 %v3096_v19, %v1542_v20 }
 0xf40   :  { %v1639_v24 = vmul.f32 %v3098_v21, %v1637_v22 }
 0xf41   :  { %1546 = vrot.lane.b32.xlu0 %v1544_v23, %s3199_s28 }
 0xf42   :  { %1641 = vrot.lane.b32.xlu1 %v1639_v24, %s3199_s28 }
 0xfb3   :  { %v1547_v27 = vpop.permute.xlu0 %1546 }
 0xfb4   :  { %v1642_v28 = vpop.permute.xlu1 %1641  ;;  %v3575_v30 = vadd.f32 %v1547_v27, %v1539_v25  ;;  %v3143_v25 = vld [vmem:[%s3684_s3] ss:$0 sm:$0xff]  ;;  %s3200_s3 = smov [#allocation5]  }
 0xfb5   :  { %v3577_v31 = vadd.f32 %v1642_v28, %v1634_v26  ;;  %s2391_s11 = sshll.u32 %s3200_s3, 4  ;;  %s2392_s11 = int_to_ptr.vmem [resolvable:$true] %s2391_s11 }
 0xfb6   :  { %3099 = vtanh.f32 %v3575_v30  ;;  %p3171_p9 = scmp.lt.s32.totalorder %s2392_s11, %s2392_s11 }
 0xfb7   :  { %3101 = vtanh.f32 %v3577_v31 }
 0xfc0   :  { %v3100_v32 = vpop.eup %3099 }
 0xfc1   :  { %v3102_v34 = vpop.eup %3101  ;;  %1552 = vrot.lane.b32.xlu0 %v3100_v32, %s3198_s27 }
 0xfc2   :  { %1647 = vrot.lane.b32.xlu1 %v3102_v34, %s3198_s27 }
0x1033   :  { %v1553_v54 = vpop.permute.xlu0 %1552 }
0x1034   :  { %v1648_v35 = vpop.permute.xlu1 %1647  ;;  %v1555_v29 = vmul.f32 %v3096_v19, %v1553_v54 }
0x1035   :  { %v1650_v36 = vmul.f32 %v3098_v21, %v1648_v35 }
0x1036   :  { %1652 = vrot.lane.b32.xlu0 %v1555_v29, %s3199_s28 }
0x1037   :  { %1727 = vrot.lane.b32.xlu1 %v1650_v36, %s3199_s28 }
0x10a8   :  { %v1653_v38 = vpop.permute.xlu0 %1652 }
0x10a9   :  { %v1728_v39 = vpop.permute.xlu1 %1727  ;;  %2779 = vmatmul.mubr.msk.f32.vlgmr.msra.gmra.mrb[22].mxu0 %vm207_vm2, %v1653_v38 }
0x10aa   :  { %2790 = vmatmul.mubr.msk.f32.vlgmr.msra.gmra.mrb[18].mxu1 %vm207_vm2, %v1728_v39  ;;  %2972 = vmatpush3.bf16.msra.mxu0 %v3265_v8 }
0x10ab   :  { %2973 = vmatprep.subr.bf16.mxu0 %v3195_v0  ;;  %2800 = vmatprep.mubr.msk.f32.mxu0 %vm3196_vm0, %v3197_v1 }
0x10ac   :  { %2978 = vmatpush3.bf16.msra.mxu1 %v3321_v37  ;;  %2811 = vmatprep.mubr.msk.f32.mxu1 %vm3196_vm0, %v3197_v1 }
0x10ad   :  { %2979 = vmatprep.subr.bf16.mxu1 %v3195_v0 }
0x10ae   :  { %2975 = vmatpush3.bf16.msra.mxu0 %v3278_v12 }
0x10af   :  { %2982 = vmatprep.subr.bf16.mxu0 %v3195_v0 }
0x10b0   :  { %2981 = vmatpush3.bf16.msra.mxu1 %v3342_v43 }
0x10b1   :  { %2801 = vmatmul.mubr.msk.f32.vlgmr.msra.gmra.mrb[24].mxu0 %vm207_vm2, %v1728_v39  ;;  %2988 = vmatprep.subr.bf16.mxu1 %v3195_v0 }
0x10b2   :  { %2984 = vmatpush3.bf16.msra.mxu0 %v3310_v33  ;;  %2822 = vmatprep.mubr.msk.f32.mxu0 %vm3196_vm0, %v3197_v1 }
0x10b3   :  { %2985 = vmatprep.subr.bf16.mxu0 %v3195_v0 }
0x10b6   :  { %2987 = vmatpush3.bf16.msra.mxu0 %v3344_v44 }
0x10b7   :  { %2994 = vmatprep.subr.bf16.mxu0 %v3195_v0 }
0x117c   :  { %v1722_v40 = vpop.f32.mrb[22].mxu0 }
0x117d   :  { %v1797_v41 = vpop.f32.mrb[18].mxu1  ;;  %v2780_v42 = vpop.f32.mrb[23].mxu0 }
0x117e   :  { %v1798_v51 = vadd.f32 %v1797_v41, %v1722_v40  ;;  %v2791_v45 = vpop.f32.mrb[19].mxu1 }
0x1180   :  { %v1801_v46 = vadd.f32 %v3407_v61, %v1798_v51 }
0x1182   :  { %3103 = vtanh.f32 %v1801_v46  ;;  %v2437_v59 = vmul.f32 -1.442695, %v1801_v46 }
0x1184   :  { %v1892_v48 = vpop.f32.mrb[24].mxu0 }
0x1185   :  { %v1896_v49 = vadd.f32 %v1892_v48, %v180_v47  ;;  %v2802_v50 = vpop.f32.mrb[25].mxu0 }
0x1187   :  { %3105 = vtanh.f32 %v1896_v49  ;;  %v2439_v60 = vmul.f32 -1.442695, %v1896_v49 }
0x1188   :  { %3107 = vpow2.f32 %v2437_v59 }
0x1189   :  { %3109 = vpow2.f32 %v2439_v60 }
0x118c   :  { %v3104_v55 = vpop.eup %3103 }
0x118d   :  { %1811 = vrot.lane.b32.xlu0 %v3104_v55, %s3198_s27 }
0x1191   :  { %v3106_v57 = vpop.eup %3105 }
0x1192   :  { %1906 = vrot.lane.b32.xlu1 %v3106_v57, %s3198_s27  ;;  %v3108_v62 = vpop.eup %3107 }
0x1193   :  { %v1805_v63 = vadd.f32 1.0, %v3108_v62  ;;  %v3110_v2 = vpop.eup %3109 }
0x1194   :  { %v1900_v3 = vadd.f32 1.0, %v3110_v2 }
0x1195   :  { %3111 = vrcp.f32 %v1805_v63 }
0x1196   :  { %3113 = vrcp.f32 %v1900_v3 }
0x119f   :  { %v3112_v13 = vpop.eup %3111 }
0x11a0   :  { %v3114_v52 = vpop.eup %3113  ;;  %v1809_v7 = vmul.f32 %v3112_v13, %v3575_v30 }
0x11a1   :  { %v1904_v11 = vmul.f32 %v3114_v52, %v3577_v31 }
0x11ff   :  { %v1812_v58 = vpop.permute.xlu0 %1811 }
0x1200   :  { %v1814_v4 = vmul.f32 %v3112_v13, %v1812_v58 }
0x1202   :  { %1816 = vrot.lane.b32.xlu0 %v1814_v4, %s3199_s28 }
0x1204   :  { %v1907_v5 = vpop.permute.xlu1 %1906 }
0x1205   :  { %v1909_v6 = vmul.f32 %v3114_v52, %v1907_v5 }
0x1207   :  { %1911 = vrot.lane.b32.xlu1 %v1909_v6, %s3199_s28 }
0x1274   :  { %v1817_v9 = vpop.permute.xlu0 %1816 }
0x1275   :  { %v3614_v10 = vadd.f32 %v1817_v9, %v1809_v7 }
0x1277   :  { %3115 = vtanh.f32 %v3614_v10 }
0x1279   :  { %v1912_v14 = vpop.permute.xlu1 %1911 }
0x127a   :  { %v3618_v15 = vadd.f32 %v1912_v14, %v1904_v11 }
0x127c   :  { %3117 = vtanh.f32 %v3618_v15 }
0x1281   :  { %v3116_v16 = vpop.eup %3115 }
0x1282   :  { %1822 = vrot.lane.b32.xlu0 %v3116_v16, %s3198_s27 }
0x1286   :  { %v3118_v17 = vpop.eup %3117 }
0x1287   :  { %1917 = vrot.lane.b32.xlu1 %v3118_v17, %s3198_s27 }
0x12f4   :  { %v1823_v53 = vpop.permute.xlu0 %1822 }
0x12f5   :  { %v1825_v18 = vmul.f32 %v3112_v13, %v1823_v53 }
0x12f7   :  { %1922 = vrot.lane.b32.xlu0 %v1825_v18, %s3199_s28 }
0x12f9   :  { %v1918_v19 = vpop.permute.xlu1 %1917 }
0x12fa   :  { %v1920_v20 = vmul.f32 %v3114_v52, %v1918_v19 }
0x12fc   :  { %1997 = vrot.lane.b32.xlu1 %v1920_v20, %s3199_s28 }
0x1369   :  { %v1923_v21 = vpop.permute.xlu0 %1922 }
0x136a   :  { %2812 = vmatmul.mubr.msk.f32.vlgmr.msra.gmra.mrb[20].mxu1 %vm207_vm2, %v1923_v21 }
0x136b   :  { %2990 = vmatpush3.bf16.msra.mxu1 %v3265_v8  ;;  %2833 = vmatprep.mubr.msk.f32.mxu1 %vm3196_vm0, %v3197_v1 }
0x136c   :  { %2991 = vmatprep.subr.bf16.mxu1 %v3195_v0 }
0x136e   :  { %v1998_v22 = vpop.permute.xlu1 %1997 }
0x136f   :  { %2993 = vmatpush3.bf16.msra.mxu1 %v3278_v12  ;;  %2823 = vmatmul.mubr.msk.f32.vlgmr.msra.gmra.mrb[26].mxu0 %vm207_vm2, %v1998_v22 }
0x1370   :  { %3000 = vmatprep.subr.bf16.mxu1 %v3195_v0  ;;  %2996 = vmatpush3.bf16.msra.mxu0 %v3321_v37 }
0x1371   :  { %2997 = vmatprep.subr.bf16.mxu0 %v3195_v0  ;;  %2844 = vmatprep.mubr.msk.f32.mxu0 %vm3196_vm0, %v3197_v1 }
0x1372   :  { %2834 = vmatmul.mubr.msk.f32.vlgmr.msra.gmra.mrb[22].mxu1 %vm207_vm2, %v1998_v22 }
0x1373   :  { %3002 = vmatpush3.bf16.msra.mxu1 %v3310_v33  ;;  %2855 = vmatprep.mubr.msk.f32.mxu1 %vm3196_vm0, %v3197_v1  ;;  %v185_v33 = vadd.f32 %v3143_v25, %v3384_v56 }
0x1374   :  { %3003 = vmatprep.subr.bf16.mxu1 %v3195_v0  ;;  %2999 = vmatpush3.bf16.msra.mxu0 %v3342_v43 }
0x1377   :  { %3005 = vmatpush3.bf16.msra.mxu1 %v3344_v44 }
0x143d   :  { %v1992_v8 = vpop.f32.mrb[20].mxu1 }
0x143e   :  { %v2813_v12 = vpop.f32.mrb[21].mxu1 }
0x1442   :  { %v2067_v37 = vpop.f32.mrb[26].mxu0 }
0x1443   :  { %v2068_v23 = vadd.f32 %v2067_v37, %v1992_v8  ;;  %v2824_v24 = vpop.f32.mrb[27].mxu0 }
0x1445   :  { %v2071_v26 = vadd.f32 %v3407_v61, %v2068_v23  ;;  %v2162_v1 = vpop.f32.mrb[22].mxu1 }
0x1446   :  { %v2166_v27 = vadd.f32 %v2162_v1, %v185_v33  ;;  %v2835_v0 = vpop.f32.mrb[23].mxu1 }
0x1447   :  { %3119 = vtanh.f32 %v2071_v26  ;;  %v2442_v28 = vmul.f32 -1.442695, %v2071_v26 }
0x1448   :  { %3121 = vtanh.f32 %v2166_v27  ;;  %v2444_v30 = vmul.f32 -1.442695, %v2166_v27 }
0x1449   :  { %3123 = vpow2.f32 %v2442_v28 }
0x144a   :  { %3125 = vpow2.f32 %v2444_v30 }
0x1451   :  { %v3120_v43 = vpop.eup %3119 }
0x1452   :  { %v3122_v44 = vpop.eup %3121  ;;  %2081 = vrot.lane.b32.xlu0 %v3120_v43, %s3198_s27 }
0x1453   :  { %2176 = vrot.lane.b32.xlu1 %v3122_v44, %s3198_s27  ;;  %v3124_v31 = vpop.eup %3123 }
0x1454   :  { %v3126_v32 = vpop.eup %3125  ;;  %v2075_v56 = vadd.f32 1.0, %v3124_v31 }
0x1455   :  { %v2170_v34 = vadd.f32 1.0, %v3126_v32 }
0x1456   :  { %3127 = vrcp.f32 %v2075_v56 }
0x1457   :  { %3129 = vrcp.f32 %v2170_v34 }
0x1460   :  { %v3128_v54 = vpop.eup %3127 }
0x1461   :  { %v3130_v29 = vpop.eup %3129  ;;  %v2079_v40 = vmul.f32 %v3128_v54, %v3614_v10 }
0x1462   :  { %v2174_v41 = vmul.f32 %v3130_v29, %v3618_v15 }
0x14c4   :  { %v2082_v35 = vpop.permute.xlu0 %2081 }
0x14c5   :  { %v2177_v36 = vpop.permute.xlu1 %2176  ;;  %v2084_v38 = vmul.f32 %v3128_v54, %v2082_v35 }
0x14c6   :  { %v2179_v39 = vmul.f32 %v3130_v29, %v2177_v36 }
0x14c7   :  { %2086 = vrot.lane.b32.xlu0 %v2084_v38, %s3199_s28 }
0x14c8   :  { %2181 = vrot.lane.b32.xlu1 %v2179_v39, %s3199_s28 }
0x1539   :  { %v2087_v42 = vpop.permute.xlu0 %2086 }
0x153a   :  { %v2182_v51 = vpop.permute.xlu1 %2181  ;;  %v2089_v45 = vadd.f32 %v2087_v42, %v2079_v40 }
0x153b   :  { %v2184_v46 = vadd.f32 %v2182_v51, %v2174_v41 }
0x153c   :  { %3131 = vtanh.f32 %v2089_v45 }
0x153d   :  { %3133 = vtanh.f32 %v2184_v46 }
0x1546   :  { %v3132_v47 = vpop.eup %3131 }
0x1547   :  { %v3134_v48 = vpop.eup %3133  ;;  %2092 = vrot.lane.b32.xlu0 %v3132_v47, %s3198_s27 }
0x1548   :  { %2187 = vrot.lane.b32.xlu1 %v3134_v48, %s3198_s27 }
0x15b9   :  { %v2093_v49 = vpop.permute.xlu0 %2092 }
0x15ba   :  { %v2188_v50 = vpop.permute.xlu1 %2187  ;;  %v2095_v55 = vmul.f32 %v3128_v54, %v2093_v49 }
0x15bb   :  { %v2190_v57 = vmul.f32 %v3130_v29, %v2188_v50 }
0x15bc   :  { %2192 = vrot.lane.b32.xlu0 %v2095_v55, %s3199_s28 }
0x15bd   :  { %2267 = vrot.lane.b32.xlu1 %v2190_v57, %s3199_s28 }
0x162e   :  { %v2193_v59 = vpop.permute.xlu0 %2192 }
0x162f   :  { %v2268_v60 = vpop.permute.xlu1 %2267  ;;  %2845 = vmatmul.mubr.msk.f32.vlgmr.msra.gmra.mrb[28].mxu0 %vm207_vm2, %v2193_v59 }
0x1630   :  { %2856 = vmatmul.mubr.msk.f32.vlgmr.msra.gmra.mrb[24].mxu1 %vm207_vm2, %v2268_v60 }
0x1702   :  { %v2262_v62 = vpop.f32.mrb[28].mxu0 }
0x1703   :  { %v2337_v63 = vpop.f32.mrb[24].mxu1  ;;  %v2846_v2 = vpop.f32.mrb[29].mxu0 }
0x1704   :  { %v2338_v3 = vadd.f32 %v2337_v63, %v2262_v62  ;;  %v2857_v13 = vpop.f32.mrb[25].mxu1 }
0x1706   :  { %v2341_v58 = vadd.f32 %v3407_v61, %v2338_v3 }
0x1708   :  { %3135 = vtanh.f32 %v2341_v58  ;;  %v2447_v52 = vmul.f32 -1.442695, %v2341_v58 }
0x170a   :  { %3137 = vpow2.f32 %v2447_v52 }
0x1712   :  { %v3136_v4 = vpop.eup %3135 }
0x1713   :  { %2351 = vrot.lane.b32.xlu0 %v3136_v4, %s3198_s27 }
0x1714   :  { %v3138_v5 = vpop.eup %3137 }
0x1715   :  { %v2345_v6 = vadd.f32 1.0, %v3138_v5 }
0x1717   :  { %3139 = vrcp.f32 %v2345_v6 }
0x1721   :  { %v3140_v7 = vpop.eup %3139 }
0x1722   :  { %v2349_v11 = vmul.f32 %v3140_v7, %v2089_v45 }
0x1785   :  { %v2352_v9 = vpop.permute.xlu0 %2351 }
0x1786   :  { %v2354_v10 = vmul.f32 %v3140_v7, %v2352_v9 }
0x1788   :  { %2356 = vrot.lane.b32.xlu1 %v2354_v10, %s3199_s28 }
0x17fa   :  { %v2357_v14 = vpop.permute.xlu1 %2356 }
0x17fb   :  { %v2359_v15 = vadd.f32 %v2357_v14, %v2349_v11 }
0x17fd   :  { %3141 = vtanh.f32 %v2359_v15 }
0x1807   :  { %v3142_v16 = vpop.eup %3141 }
0x1808   :  { %2362 = vrot.lane.b32.xlu0 %v3142_v16, %s3198_s27 }
0x180c   :  { %2372 = vrot.lane.b32.xlu0 %v2184_v46, %s3199_s28  ;;  %s3166_s28 = scalar_lea.vmem %s2392_s11, 128 }
0x180d   :  { %p3167_p8 = scmp.ne.s32.totalorder %s2392_s11, %s3166_s28  ;;  %p3172_p10 = scmp.lt.s32.totalorder %s3166_s28, %s3166_s28 }
0x180f   :  { %p3173_p11 = por %p3172_p10, %p3171_p9 }
0x1811   :  { %p3174_p12 = pnand %p3173_p11, %p3167_p8 }
0x187a   :  { %v2363_v61 = vpop.permute.xlu0 %2362 }
0x187b   :  { %v2365_v17 = vmul.f32 %v3140_v7, %v2363_v61 }
0x187d   :  { %2368 = vrot.lane.b32.xlu1 %v2365_v17, %s3198_s27 }
0x187e   :  { %v2373_v19 = vpop.permute.xlu0 %2372 }
0x1881   :  { %2376 = vrot.lane.b32.xlu1 %v2359_v15, %s3198_s27 }
0x18ef   :  { %v2369_v53 = vpop.permute.xlu1 %2368 }
0x18f0   :  { %v2379_v18 = vsel %vm207_vm2, %v2268_v60, %v2369_v53 }
0x18f1   :  { %v2381_v21 = vsel %vm2380_vm3, %v2379_v18, %v2373_v19 }
0x18f3   :  { %v2377_v20 = vpop.permute.xlu1 %2376 }
0x18f4   :  { %v2383_v22 = vsel %vm2382_vm4, %v2381_v21, %v2377_v20 }
0x18f5   :  { %2384 = vst [vmem:[#allocation5] sm:$0xff] %v2383_v22 }
0x18f6   :  { %3177 = shalt.err (!%p3174_p12)
}
0x18f7   :  { %s3178_s13 = scalar_lea.hbm %s3688_s7, 128 }
0x18f8   :  { %p3179_p13 = scmp.ne.s32.totalorder %s3688_s7, %s3178_s13  ;;  %p3182_p0 = scmp.lt.u32.totalorder %s3178_s13, %s3688_s7 }
0x18fa   :  { %p3184_p1 = pnand %p3182_p0, %p3179_p13 }
0x18fc   :  { %3187 = shalt.err (!%p3184_p1)
}
0x18fd   :  { %2394 = dma.vmem_to_hbm [thread:$0]  %s2392_s11, 128, %s3688_s7, [#allocation4]  }
0x18fe   :  { %3190 = dma.done.wait [#allocation4], 128  }
0x18ff   :  { %3191 = vsyncadd [#allocation4], 4294967168 }
0x1900   :  { %2398 = vsyncpa [#allocation3], 1 }
0x1901   :  { %2399 = vsyncpa [#allocation4], 1 }

</bundles_post_ra>
